<compile_context>
chip_gen: v7x
topology: tpu7x:2x2x1
jax: 0.10.0
libtpu: 0.0.40
codegen_flags: <defaults>
</compile_context>

<pallas_src>
import math

import jax
import jax.numpy as jnp
from jax import lax
from jax.experimental import pallas as pl
from jax.experimental.pallas import tpu as pltpu

d_k = d_v = 64
d_model = 512
n_heads = 8


def _tpu_vmem_capacity_bytes():
    try:
        return int(pltpu.get_tpu_info().vmem_capacity_bytes)
    except Exception:
        return 128 * 1024 * 1024  # assume a 128 MiB part if query unavailable


_VMEM_PHYS = _tpu_vmem_capacity_bytes()
_PROJ_VMEM_LIMIT = 32 * 1024 * 1024
# v5e/v6e (128 MiB physical) -> 96 MiB;  v7x-class (64 MiB) -> 48 MiB.
_ATTN_VMEM_LIMIT = max(32 * 1024 * 1024,
                       min(96 * 1024 * 1024, (_VMEM_PHYS * 3) // 4))
_SINGLE_BUFFER_KV = _VMEM_PHYS <= 64 * 1024 * 1024  # VMEM-thrifty on v7x-class


# ---------------------------------------------------------------------------
# Kernel 1a: fused Q/K/V projections (separate activations), M-tiled.
#   xq/xk/xv : (tm, 512) bf16   w : (3, 512, 512) bf16   b : (3, 1, 512) f32
# ---------------------------------------------------------------------------
def _qkv_proj_kernel(xq_ref, xk_ref, xv_ref, w_ref, b_ref,
                     qo_ref, ko_ref, vo_ref):
    qo_ref[...] = (jnp.dot(xq_ref[...], w_ref[0],
                           preferred_element_type=jnp.float32)
                   + b_ref[0]).astype(qo_ref.dtype)
    ko_ref[...] = (jnp.dot(xk_ref[...], w_ref[1],
                           preferred_element_type=jnp.float32)
                   + b_ref[1]).astype(ko_ref.dtype)
    vo_ref[...] = (jnp.dot(xv_ref[...], w_ref[2],
                           preferred_element_type=jnp.float32)
                   + b_ref[2]).astype(vo_ref.dtype)


def qkv_projection(xq, xk, xv, w_qkv, b_qkv):
    M = xq.shape[0]
    tm = min(M, 512)  # HBM-streaming bound: large row tile amortises overhead
    grid = (pl.cdiv(M, tm),)

    x_spec = pl.BlockSpec((tm, d_model), lambda i: (i, 0))
    w_spec = pl.BlockSpec((3, d_model, d_model), lambda i: (0, 0, 0))
    b_spec = pl.BlockSpec((3, 1, d_model), lambda i: (0, 0, 0))
    o_spec = pl.BlockSpec((tm, d_model), lambda i: (i, 0))
    o_shape = jax.ShapeDtypeStruct((M, d_model), jnp.bfloat16)

    return pl.pallas_call(
        _qkv_proj_kernel,
        out_shape=(o_shape, o_shape, o_shape),
        grid=grid,
        in_specs=[x_spec, x_spec, x_spec, w_spec, b_spec],
        out_specs=(o_spec, o_spec, o_spec),
        compiler_params=pltpu.CompilerParams(
            dimension_semantics=("parallel",),
            vmem_limit_bytes=_PROJ_VMEM_LIMIT),
    )(xq, xk, xv, w_qkv, b_qkv)


# ---------------------------------------------------------------------------
# Kernel 1b: self-attention fast path — activations streamed ONCE,
#   one (tm, 512) @ (512, 1536) matmul (W_Q|W_K|W_V concatenated along N).
# ---------------------------------------------------------------------------
def _qkv_proj_fused_kernel(x_ref, w_ref, b_ref, qo_ref, ko_ref, vo_ref):
    y = jnp.dot(x_ref[...], w_ref[...],
                preferred_element_type=jnp.float32) + b_ref[...]
    qo_ref[...] = y[:, 0 * d_model:1 * d_model].astype(qo_ref.dtype)
    ko_ref[...] = y[:, 1 * d_model:2 * d_model].astype(ko_ref.dtype)
    vo_ref[...] = y[:, 2 * d_model:3 * d_model].astype(vo_ref.dtype)


def qkv_projection_fused(x, w_cat, b_cat):
    M = x.shape[0]
    tm = min(M, 512)
    grid = (pl.cdiv(M, tm),)

    x_spec = pl.BlockSpec((tm, d_model), lambda i: (i, 0))
    w_spec = pl.BlockSpec((d_model, 3 * d_model), lambda i: (0, 0))
    b_spec = pl.BlockSpec((1, 3 * d_model), lambda i: (0, 0))
    o_spec = pl.BlockSpec((tm, d_model), lambda i: (i, 0))
    o_shape = jax.ShapeDtypeStruct((M, d_model), jnp.bfloat16)

    return pl.pallas_call(
        _qkv_proj_fused_kernel,
        out_shape=(o_shape, o_shape, o_shape),
        grid=grid,
        in_specs=[x_spec, w_spec, b_spec],
        out_specs=(o_spec, o_spec, o_spec),
        compiler_params=pltpu.CompilerParams(
            dimension_semantics=("parallel",),
            vmem_limit_bytes=_PROJ_VMEM_LIMIT),
    )(x, w_cat, b_cat)


# ---------------------------------------------------------------------------
# Kernel 2: attention core + output projection for one (batch, q-tile) cell.
#   q : (tq, 512) bf16   k/v : (S, 512) bf16   mask : (HM, tq, S) int8
#   wo: (512, 512) bf16  bo  : (1, 512) f32    out : (tq, 512) bf16
#   ctx_ref: (tq, 512) bf16 VMEM scratch (packed per-head contexts)
# Note: 1/sqrt(d_k) is folded into the Q projection weights.
# ---------------------------------------------------------------------------
def _attn_out_kernel(q_ref, k_ref, v_ref, m_ref, wo_ref, bo_ref, o_ref,
                     ctx_ref):
    mask_heads = m_ref.shape[0]
    neg = jnp.float32(-1e9)
    if mask_heads == 1:
        masked = m_ref[0] != 0                           # hoisted (tq, S) bool

    for h in range(n_heads):                             # static unroll
        qh = q_ref[:, h * d_k:(h + 1) * d_k]             # (tq, d_k) bf16
        kh = k_ref[:, h * d_k:(h + 1) * d_k]             # (S , d_k) bf16
        vh = v_ref[:, h * d_v:(h + 1) * d_v]             # (S , d_v) bf16

        # scores = qh @ kh^T  (MXU, f32 accumulation)
        s = lax.dot_general(qh, kh, (((1,), (1,)), ((), ())),
                            preferred_element_type=jnp.float32)   # (tq, S)
        m = masked if mask_heads == 1 else (m_ref[h] != 0)
        s = jnp.where(m, neg, s)

        # numerically-stable softmax with DEFERRED normalisation
        s = s - jnp.max(s, axis=-1, keepdims=True)
        p = jnp.exp(s)
        denom = jnp.sum(p, axis=-1, keepdims=True)                # (tq, 1)

        ctx = jnp.dot(p.astype(jnp.bfloat16), vh,
                      preferred_element_type=jnp.float32)         # (tq, d_v)
        ctx = ctx * pl.reciprocal(denom, approx=True)             # EUP slot

        # pack the head context into the lane-offset slab of the scratch
        ctx_ref[:, h * d_v:(h + 1) * d_v] = ctx.astype(jnp.bfloat16)

    # ONE full-depth output projection: (tq,512)@(512,512) + bias
    o_ref[...] = (jnp.dot(ctx_ref[...], wo_ref[...],
                          preferred_element_type=jnp.float32)
                  + bo_ref[...]).astype(o_ref.dtype)


def attention_output(q, k, v, mask_i8, w_o, b_o):
    B, S, _ = q.shape
    HM = mask_i8.shape[1]
    tq = S if (S <= 128 or S % 128 != 0) else 128
    grid = (B, S // tq)

    def build(single_buffer_kv):
        kv_kwargs = (dict(pipeline_mode=pl.Buffered(1))
                     if single_buffer_kv else {})
        q_spec = pl.BlockSpec((None, tq, d_model), lambda b, qi: (b, qi, 0))
        kv_spec = pl.BlockSpec((None, S, d_model), lambda b, qi: (b, 0, 0),
                               **kv_kwargs)
        m_spec = pl.BlockSpec((None, HM, tq, S), lambda b, qi: (b, 0, qi, 0))
        wo_spec = pl.BlockSpec((d_model, d_model), lambda b, qi: (0, 0))
        bo_spec = pl.BlockSpec((1, d_model), lambda b, qi: (0, 0))
        o_spec = pl.BlockSpec((None, tq, d_model), lambda b, qi: (b, qi, 0))
        return pl.pallas_call(
            _attn_out_kernel,
            out_shape=jax.ShapeDtypeStruct((B, S, d_model), jnp.bfloat16),
            grid=grid,
            in_specs=[q_spec, kv_spec, kv_spec, m_spec, wo_spec, bo_spec],
            out_specs=o_spec,
            scratch_shapes=[pltpu.VMEM((tq, d_model), jnp.bfloat16)],
            compiler_params=pltpu.CompilerParams(
                dimension_semantics=("parallel", "parallel"),
                vmem_limit_bytes=_ATTN_VMEM_LIMIT),
        )

    if _SINGLE_BUFFER_KV:
        try:
            return build(True)(q, k, v, mask_i8, w_o, b_o)
        except Exception:
            pass  # fall back to default double-buffering if Buffered(1) fails
    return build(False)(q, k, v, mask_i8, w_o, b_o)


# ---------------------------------------------------------------------------
# Parameter prep (one-time): cast to bf16, fold 1/sqrt(d_k) into W_Q/b_Q,
# build both the stacked and the column-concatenated QKV weights.
# ---------------------------------------------------------------------------
def prepare_params(p):
    scale = 1.0 / math.sqrt(d_k)
    w_q, b_q = p["W_Q"] * scale, p["b_Q"] * scale
    w_qkv = jnp.stack([w_q, p["W_K"], p["W_V"]]).astype(jnp.bfloat16)
    b_qkv = jnp.stack([b_q, p["b_K"], p["b_V"]]
                      ).reshape(3, 1, d_model).astype(jnp.float32)
    w_cat = jnp.concatenate([w_q, p["W_K"], p["W_V"]],
                            axis=1).astype(jnp.bfloat16)
    b_cat = jnp.concatenate([b_q, p["b_K"], p["b_V"]]
                            ).reshape(1, 3 * d_model).astype(jnp.float32)
    return {
        "w_qkv": w_qkv, "b_qkv": b_qkv,
        "w_qkv_cat": w_cat, "b_qkv_cat": b_cat,
        "w_o": p["W_O"].astype(jnp.bfloat16),
        "b_o": p["b_O"].reshape(1, d_model).astype(jnp.float32),
    }


def _normalize_mask(attn_mask, B, S):
    """Accept [S,S] / [B,S,S] / [B,1,S,S] / [B,H,S,S]; keep head dim compact."""
    m = attn_mask
    if m.ndim == 2:
        m = m[None, None]
    elif m.ndim == 3:
        m = m[:, None]
    hm = m.shape[1]
    if hm not in (1, n_heads):
        m = jnp.broadcast_to(m, (m.shape[0], n_heads, m.shape[2], m.shape[3]))
        hm = n_heads
    m = jnp.broadcast_to(m, (B, hm, S, S))
    return m.astype(jnp.int8)


# ---------------------------------------------------------------------------
# Full module forward.  Q/K/V: [B, S, d_model];  attn_mask: bool (True=masked)
# ---------------------------------------------------------------------------
def multi_head_attention(Q, K, V, attn_mask, prep):
    B, S, _ = Q.shape
    assert K.shape == V.shape and K.shape[1] == S, "equal seq lengths assumed"
    mask_i8 = _normalize_mask(attn_mask, B, S)

    if (Q is K) and (K is V):        # self-attention: stream activations once
        x = Q.reshape(B * S, d_model).astype(jnp.bfloat16)
        q, k, v = qkv_projection_fused(x, prep["w_qkv_cat"], prep["b_qkv_cat"])
    else:
        xq = Q.reshape(B * S, d_model).astype(jnp.bfloat16)
        xk = K.reshape(B * S, d_model).astype(jnp.bfloat16)
        xv = V.reshape(B * S, d_model).astype(jnp.bfloat16)
        q, k, v = qkv_projection(xq, xk, xv, prep["w_qkv"], prep["b_qkv"])

    q = q.reshape(B, S, d_model)   # free reshapes; heads stay packed in lanes
    k = k.reshape(B, S, d_model)
    v = v.reshape(B, S, d_model)
    return attention_output(q, k, v, mask_i8, prep["w_o"], prep["b_o"])


# ---------------------------------------------------------------------------
# Pure-JAX (f32) reference for validation
# ---------------------------------------------------------------------------
def reference(Q, K, V, attn_mask, p):
    B, S, _ = Q.shape
    q = (Q @ p["W_Q"] + p["b_Q"]).reshape(B, S, n_heads, d_k).transpose(0, 2, 1, 3)
    k = (K @ p["W_K"] + p["b_K"]).reshape(B, S, n_heads, d_k).transpose(0, 2, 1, 3)
    v = (V @ p["W_V"] + p["b_V"]).reshape(B, S, n_heads, d_v).transpose(0, 2, 1, 3)
    scores = jnp.einsum("bhqd,bhkd->bhqk", q, k) / jnp.sqrt(jnp.float32(d_k))
    scores = jnp.where(attn_mask, jnp.float32(-1e9), scores)
    attn = jax.nn.softmax(scores, axis=-1)
    ctx = jnp.einsum("bhqk,bhkd->bhqd", attn, v)
    ctx = ctx.transpose(0, 2, 1, 3).reshape(B, S, d_model)
    return ctx @ p["W_O"] + p["b_O"]


if __name__ == "__main__":
    key = jax.random.PRNGKey(0)
    keys = jax.random.split(key, 12)
    wscale = 1.0 / math.sqrt(d_model)

    params = {
        "W_Q": jax.random.normal(keys[0], (d_model, d_model), jnp.float32) * wscale,
        "b_Q": jax.random.normal(keys[1], (d_model,), jnp.float32) * 0.01,
        "W_K": jax.random.normal(keys[2], (d_model, d_model), jnp.float32) * wscale,
        "b_K": jax.random.normal(keys[3], (d_model,), jnp.float32) * 0.01,
        "W_V": jax.random.normal(keys[4], (d_model, d_model), jnp.float32) * wscale,
        "b_V": jax.random.normal(keys[5], (d_model,), jnp.float32) * 0.01,
        "W_O": jax.random.normal(keys[6], (d_model, d_model), jnp.float32) * wscale,
        "b_O": jax.random.normal(keys[7], (d_model,), jnp.float32) * 0.01,
    }
    prep = prepare_params(params)
    tol = dict(rtol=5e-2, atol=5e-2)   # bf16 MXU matmuls + approx reciprocal

    # ---- Test 1: small cross-attention, head-invariant compact mask --------
    B, S = 2, 8
    Q = jax.random.normal(keys[8], (B, S, d_model), jnp.float32)
    K = jax.random.normal(keys[9], (B, S, d_model), jnp.float32)
    V = jax.random.normal(keys[10], (B, S, d_model), jnp.float32)
    causal = jnp.triu(jnp.ones((S, S), dtype=bool), k=1)      # True = masked
    mask_compact = jnp.broadcast_to(causal, (B, 1, S, S))
    mask_full = jnp.broadcast_to(causal, (B, n_heads, S, S))

    out1 = jax.block_until_ready(multi_head_attention(Q, K, V, mask_compact, prep))
    ref1 = reference(Q, K, V, mask_full, params)
    assert out1.shape == (B, S, d_model)
    assert jnp.allclose(out1.astype(jnp.float32), ref1, **tol), "mismatch (cross)"

    # ---- Test 2: self-attention fast path, explicit per-head mask ----------
    out2 = jax.block_until_ready(multi_head_attention(Q, Q, Q, mask_full, prep))
    ref2 = reference(Q, Q, Q, mask_full, params)
    assert jnp.allclose(out2.astype(jnp.float32), ref2, **tol), "mismatch (self)"

    # ---- Test 3: multi-q-tile path (S=256 -> tq=128, 2 q-tiles per batch) --
    S3 = 256
    Q3 = jax.random.normal(keys[11], (B, S3, d_model), jnp.float32)
    K3 = jax.random.normal(keys[9], (B, S3, d_model), jnp.float32)
    V3 = jax.random.normal(keys[10], (B, S3, d_model), jnp.float32)
    causal3 = jnp.triu(jnp.ones((S3, S3), dtype=bool), k=1)
    mask3_compact = jnp.broadcast_to(causal3, (B, 1, S3, S3))
    mask3_full = jnp.broadcast_to(causal3, (B, n_heads, S3, S3))

    out3 = jax.block_until_ready(multi_head_attention(Q3, K3, V3, mask3_compact, prep))
    ref3 = reference(Q3, K3, V3, mask3_full, params)
    assert jnp.allclose(out3.astype(jnp.float32), ref3, **tol), "mismatch (tiled)"

    print("KERNEL_OK")
</pallas_src>

<mosaic_0001>
module attributes {stable_mosaic.version = 11 : i64} {
  func.func @_qkv_proj_kernel(%arg0: i32, %arg1: memref<16x512xbf16, #tpu.memory_space<vmem>>, %arg2: memref<16x512xbf16, #tpu.memory_space<vmem>>, %arg3: memref<16x512xbf16, #tpu.memory_space<vmem>>, %arg4: memref<3x512x512xbf16, #tpu.memory_space<vmem>>, %arg5: memref<3x1x512xf32, #tpu.memory_space<vmem>>, %arg6: memref<16x512xbf16, #tpu.memory_space<vmem>>, %arg7: memref<16x512xbf16, #tpu.memory_space<vmem>>, %arg8: memref<16x512xbf16, #tpu.memory_space<vmem>>) attributes {dimension_semantics = [#tpu.dimension_semantics<parallel>], iteration_bounds = array<i64: 1>, scalar_prefetch = 0 : i64, scratch_operands = 0 : i64, tpu.core_type = #tpu.core_type<tc>, window_params = [{transform_indices = @transform_0, window_bounds = array<i64: 16, 512>}, {transform_indices = @transform_1, window_bounds = array<i64: 16, 512>}, {transform_indices = @transform_2, window_bounds = array<i64: 16, 512>}, {pipeline_mode = #tpu.pipeline_mode<synchronous>, transform_indices = @transform_3, window_bounds = array<i64: 3, 512, 512>}, {pipeline_mode = #tpu.pipeline_mode<synchronous>, transform_indices = @transform_4, window_bounds = array<i64: 3, 1, 512>}, {transform_indices = @transform_5, window_bounds = array<i64: 16, 512>}, {transform_indices = @transform_6, window_bounds = array<i64: 16, 512>}, {transform_indices = @transform_7, window_bounds = array<i64: 16, 512>}]} {
    %c0 = arith.constant 0 : index
    %c0_0 = arith.constant 0 : index
    %0 = vector.load %arg1[%c0, %c0_0] : memref<16x512xbf16, #tpu.memory_space<vmem>>, vector<16x512xbf16>
    %c0_1 = arith.constant 0 : index
    %c0_2 = arith.constant 0 : index
    %c0_3 = arith.constant 0 : index
    %1 = vector.load %arg4[%c0_1, %c0_2, %c0_3] : memref<3x512x512xbf16, #tpu.memory_space<vmem>>, vector<1x512x512xbf16>
    %2 = vector.shape_cast %1 : vector<1x512x512xbf16> to vector<512x512xbf16>
    %cst = arith.constant dense<0.000000e+00> : vector<16x512xf32>
    %3 = tpu.matmul %0, %2, %cst {dimension_numbers = #tpu.dot_dimension_numbers<[1], [0], [0], [1], [0, 0, 1, 1], [], []>} : vector<16x512xbf16>, vector<512x512xbf16>, vector<16x512xf32> -> vector<16x512xf32>
    %c0_4 = arith.constant 0 : index
    %c0_5 = arith.constant 0 : index
    %c0_6 = arith.constant 0 : index
    %4 = vector.load %arg5[%c0_4, %c0_5, %c0_6] : memref<3x1x512xf32, #tpu.memory_space<vmem>>, vector<1x1x512xf32>
    %5 = vector.shape_cast %4 : vector<1x1x512xf32> to vector<1x512xf32>
    %6 = vector.broadcast %5 : vector<1x512xf32> to vector<16x512xf32>
    %7 = arith.addf %3, %6 : vector<16x512xf32>
    %8 = arith.truncf %7 : vector<16x512xf32> to vector<16x512xbf16>
    %c0_7 = arith.constant 0 : index
    %c0_8 = arith.constant 0 : index
    %9 = vector.load %arg6[%c0_7, %c0_8] : memref<16x512xbf16, #tpu.memory_space<vmem>>, vector<16x512xbf16>
    tpu.vector_store %arg6[%c0_7, %c0_8], %8 {strides = array<i32>} : memref<16x512xbf16, #tpu.memory_space<vmem>>, vector<16x512xbf16>,
    %c0_9 = arith.constant 0 : index
    %c0_10 = arith.constant 0 : index
    %10 = vector.load %arg2[%c0_9, %c0_10] : memref<16x512xbf16, #tpu.memory_space<vmem>>, vector<16x512xbf16>
    %c1 = arith.constant 1 : index
    %c0_11 = arith.constant 0 : index
    %c0_12 = arith.constant 0 : index
    %11 = vector.load %arg4[%c1, %c0_11, %c0_12] : memref<3x512x512xbf16, #tpu.memory_space<vmem>>, vector<1x512x512xbf16>
    %12 = vector.shape_cast %11 : vector<1x512x512xbf16> to vector<512x512xbf16>
    %cst_13 = arith.constant dense<0.000000e+00> : vector<16x512xf32>
    %13 = tpu.matmul %10, %12, %cst_13 {dimension_numbers = #tpu.dot_dimension_numbers<[1], [0], [0], [1], [0, 0, 1, 1], [], []>} : vector<16x512xbf16>, vector<512x512xbf16>, vector<16x512xf32> -> vector<16x512xf32>
    %c1_14 = arith.constant 1 : index
    %c0_15 = arith.constant 0 : index
    %c0_16 = arith.constant 0 : index
    %14 = vector.load %arg5[%c1_14, %c0_15, %c0_16] : memref<3x1x512xf32, #tpu.memory_space<vmem>>, vector<1x1x512xf32>
    %15 = vector.shape_cast %14 : vector<1x1x512xf32> to vector<1x512xf32>
    %16 = vector.broadcast %15 : vector<1x512xf32> to vector<16x512xf32>
    %17 = arith.addf %13, %16 : vector<16x512xf32>
    %18 = arith.truncf %17 : vector<16x512xf32> to vector<16x512xbf16>
    %c0_17 = arith.constant 0 : index
    %c0_18 = arith.constant 0 : index
    %19 = vector.load %arg7[%c0_17, %c0_18] : memref<16x512xbf16, #tpu.memory_space<vmem>>, vector<16x512xbf16>
    tpu.vector_store %arg7[%c0_17, %c0_18], %18 {strides = array<i32>} : memref<16x512xbf16, #tpu.memory_space<vmem>>, vector<16x512xbf16>,
    %c0_19 = arith.constant 0 : index
    %c0_20 = arith.constant 0 : index
    %20 = vector.load %arg3[%c0_19, %c0_20] : memref<16x512xbf16, #tpu.memory_space<vmem>>, vector<16x512xbf16>
    %c2 = arith.constant 2 : index
    %c0_21 = arith.constant 0 : index
    %c0_22 = arith.constant 0 : index
    %21 = vector.load %arg4[%c2, %c0_21, %c0_22] : memref<3x512x512xbf16, #tpu.memory_space<vmem>>, vector<1x512x512xbf16>
    %22 = vector.shape_cast %21 : vector<1x512x512xbf16> to vector<512x512xbf16>
    %cst_23 = arith.constant dense<0.000000e+00> : vector<16x512xf32>
    %23 = tpu.matmul %20, %22, %cst_23 {dimension_numbers = #tpu.dot_dimension_numbers<[1], [0], [0], [1], [0, 0, 1, 1], [], []>} : vector<16x512xbf16>, vector<512x512xbf16>, vector<16x512xf32> -> vector<16x512xf32>
    %c2_24 = arith.constant 2 : index
    %c0_25 = arith.constant 0 : index
    %c0_26 = arith.constant 0 : index
    %24 = vector.load %arg5[%c2_24, %c0_25, %c0_26] : memref<3x1x512xf32, #tpu.memory_space<vmem>>, vector<1x1x512xf32>
    %25 = vector.shape_cast %24 : vector<1x1x512xf32> to vector<1x512xf32>
    %26 = vector.broadcast %25 : vector<1x512xf32> to vector<16x512xf32>
    %27 = arith.addf %23, %26 : vector<16x512xf32>
    %28 = arith.truncf %27 : vector<16x512xf32> to vector<16x512xbf16>
    %c0_27 = arith.constant 0 : index
    %c0_28 = arith.constant 0 : index
    %29 = vector.load %arg8[%c0_27, %c0_28] : memref<16x512xbf16, #tpu.memory_space<vmem>>, vector<16x512xbf16>
    tpu.vector_store %arg8[%c0_27, %c0_28], %28 {strides = array<i32>} : memref<16x512xbf16, #tpu.memory_space<vmem>>, vector<16x512xbf16>,
    return
  }
  func.func @transform_0(%arg0: i32) -> (i32, i32) {
    %c0_i32 = arith.constant 0 : i32
    %c0_i32_0 = arith.constant 0 : i32
    return %arg0, %c0_i32 : i32, i32
  }
  func.func @transform_1(%arg0: i32) -> (i32, i32) {
    %c0_i32 = arith.constant 0 : i32
    %c0_i32_0 = arith.constant 0 : i32
    return %arg0, %c0_i32 : i32, i32
  }
  func.func @transform_2(%arg0: i32) -> (i32, i32) {
    %c0_i32 = arith.constant 0 : i32
    %c0_i32_0 = arith.constant 0 : i32
    return %arg0, %c0_i32 : i32, i32
  }
  func.func @transform_3(%arg0: i32) -> (i32, i32, i32) {
    %c0_i32 = arith.constant 0 : i32
    %c0_i32_0 = arith.constant 0 : i32
    %c0_i32_1 = arith.constant 0 : i32
    %c0_i32_2 = arith.constant 0 : i32
    return %c0_i32, %c0_i32_0, %c0_i32_1 : i32, i32, i32
  }
  func.func @transform_4(%arg0: i32) -> (i32, i32, i32) {
    %c0_i32 = arith.constant 0 : i32
    %c0_i32_0 = arith.constant 0 : i32
    %c0_i32_1 = arith.constant 0 : i32
    %c0_i32_2 = arith.constant 0 : i32
    return %c0_i32, %c0_i32_0, %c0_i32_1 : i32, i32, i32
  }
  func.func @transform_5(%arg0: i32) -> (i32, i32) {
    %c0_i32 = arith.constant 0 : i32
    %c0_i32_0 = arith.constant 0 : i32
    return %arg0, %c0_i32 : i32, i32
  }
  func.func @transform_6(%arg0: i32) -> (i32, i32) {
    %c0_i32 = arith.constant 0 : i32
    %c0_i32_0 = arith.constant 0 : i32
    return %arg0, %c0_i32 : i32, i32
  }
  func.func @transform_7(%arg0: i32) -> (i32, i32) {
    %c0_i32 = arith.constant 0 : i32
    %c0_i32_0 = arith.constant 0 : i32
    return %arg0, %c0_i32 : i32, i32
  }
}

</mosaic_0001>

<bundles_post_ra>
// kernel: tpu_custom_call.1
= control target key start
LH: loop header
LB: loop body
LE: loop exit
PB: predicated region body
PF: predicated region fallthrough
CT: control target
= control target key end

     0   :  { %13 = vsyncpa [#allocation3], 0  ;;  %s4659_s0 = inlined_call_operand.hbm [shape: bf16[16,512], index: 0, kind: input, shape index: {}]   ;;  %s4660_s1 = inlined_call_operand.hbm [shape: bf16[16,512], index: 1, kind: input, shape index: {}]   ;;  %s4661_s2 = inlined_call_operand.hbm [shape: bf16[16,512], index: 2, kind: input, shape index: {}]   ;;  %s4662_s3 = inlined_call_operand.hbm [shape: bf16[3,512,512], index: 3, kind: input, shape index: {}]   ;;  %s4663_s4 = inlined_call_operand.hbm [shape: f32[3,1,512], index: 4, kind: input, shape index: {}]   ;;  %s4664_s5 = inlined_call_operand.hbm [shape: bf16[16,512], index: 5, kind: output, shape index: {0}]   ;;  %s4665_s6 = inlined_call_operand.hbm [shape: bf16[16,512], index: 6, kind: output, shape index: {1}]   ;;  %s4666_s7 = inlined_call_operand.hbm [shape: bf16[16,512], index: 7, kind: output, shape index: {2}]  }
   0x1   :  { %14 = vsyncpa [#allocation6], 0 }
   0x2   :  { %15 = vsyncpa [#allocation9], 0 }
   0x3   :  { %16 = vsyncpa [#allocation4], 0 }
   0x4   :  { %17 = vsyncpa [#allocation13], 0  ;;  %s4449_s24 = smov [#allocation5]   ;;  %s4450_s26 = smov [#allocation8]  }
   0x5   :  { %s35_s25 = sshll.u32 %s4449_s24, 4  ;;  %s59_s27 = sshll.u32 %s4450_s26, 4  ;;  %s36_s25 = int_to_ptr.vmem [resolvable:$true] %s35_s25  ;;  %s4501_s27 = int_to_ptr.vmem [resolvable:$true] %s59_s27 }
   0x6   :  { %s4263_s30 = scalar_lea.hbm %s4660_s1, 512 }
   0x7   :  { %p4264_p0 = scmp.ne.s32.totalorder %s4660_s1, %s4263_s30  ;;  %p4267_p1 = scmp.lt.u32.totalorder %s4263_s30, %s4660_s1 }
   0x9   :  { %p4269_p2 = pnand %p4267_p1, %p4264_p0 }
   0xb   :  { %4272 = shalt.err (!%p4269_p2)
}
   0xc   :  { %s4273_s12 = scalar_lea.vmem %s36_s25, 512  ;;  %p4278_p4 = scmp.lt.s32.totalorder %s36_s25, %s36_s25 }
   0xd   :  { %p4274_p3 = scmp.ne.s32.totalorder %s36_s25, %s4273_s12  ;;  %p4279_p5 = scmp.lt.s32.totalorder %s4273_s12, %s4273_s12 }
   0xf   :  { %p4280_p6 = por %p4279_p5, %p4278_p4 }
  0x11   :  { %p4281_p7 = pnand %p4280_p6, %p4274_p3 }
  0x13   :  { %4284 = shalt.err (!%p4281_p7)
}
  0x14   :  { %s4451_s13 = smov 256   ;;  %s4452_s14 = smov 16  }
  0x15   :  { %41 = dma.hbm_to_vmem [thread:$0]  %s4660_s1, 512, %s36_s25, [#allocation6], %s4451_s13, %s4451_s13, %s4452_s14  }
  0x16   :  { %s4285_s19 = scalar_lea.hbm %s4662_s3, 49152 }
  0x17   :  { %p4286_p8 = scmp.ne.s32.totalorder %s4662_s3, %s4285_s19  ;;  %p4289_p9 = scmp.lt.u32.totalorder %s4285_s19, %s4662_s3 }
  0x19   :  { %p4291_p10 = pnand %p4289_p9, %p4286_p8 }
  0x1b   :  { %4294 = shalt.err (!%p4291_p10)
}
  0x1c   :  { %s4295_s24 = scalar_lea.vmem %s4501_s27, 49152  ;;  %p4300_p12 = scmp.lt.s32.totalorder %s4501_s27, %s4501_s27 }
  0x1d   :  { %p4296_p11 = scmp.ne.s32.totalorder %s4501_s27, %s4295_s24  ;;  %p4301_p13 = scmp.lt.s32.totalorder %s4295_s24, %s4295_s24 }
  0x1f   :  { %p4302_p0 = por %p4301_p13, %p4300_p12 }
  0x21   :  { %p4303_p1 = pnand %p4302_p0, %p4296_p11 }
  0x23   :  { %4306 = shalt.err (!%p4303_p1)
}
  0x24   :  { %65 = dma.hbm_to_vmem [thread:$0]  %s4662_s3, 49152, %s4501_s27, [#allocation9], %s4451_s13, %s4451_s13, %s4452_s14  }
  0x25   :  { %s4453_s26 = smov [#allocation2]   ;;  %s4454_s29 = smov [#allocation7]  }
  0x26   :  { %s23_s28 = sshll.u32 %s4453_s26, 4  ;;  %s47_s30 = sshll.u32 %s4454_s29, 4  ;;  %s24_s28 = int_to_ptr.vmem [resolvable:$true] %s23_s28  ;;  %s4538_s30 = int_to_ptr.vmem [resolvable:$true] %s47_s30 }
  0x27   :  { %s4307_s10 = scalar_lea.hbm %s4659_s0, 512 }
  0x28   :  { %p4308_p2 = scmp.ne.s32.totalorder %s4659_s0, %s4307_s10  ;;  %p4311_p3 = scmp.lt.u32.totalorder %s4307_s10, %s4659_s0 }
  0x2a   :  { %p4313_p4 = pnand %p4311_p3, %p4308_p2 }
  0x2c   :  { %4316 = shalt.err (!%p4313_p4)
}
  0x2d   :  { %s4317_s3 = scalar_lea.vmem %s24_s28, 512  ;;  %p4322_p6 = scmp.lt.s32.totalorder %s24_s28, %s24_s28 }
  0x2e   :  { %p4318_p5 = scmp.ne.s32.totalorder %s24_s28, %s4317_s3  ;;  %p4323_p7 = scmp.lt.s32.totalorder %s4317_s3, %s4317_s3 }
  0x30   :  { %p4324_p8 = por %p4323_p7, %p4322_p6 }
  0x32   :  { %p4325_p9 = pnand %p4324_p8, %p4318_p5 }
  0x34   :  { %4328 = shalt.err (!%p4325_p9)
}
  0x35   :  { %29 = dma.hbm_to_vmem [thread:$0]  %s4659_s0, 512, %s24_s28, [#allocation3], %s4451_s13, %s4451_s13, %s4452_s14  }
  0x36   :  { %s4329_s20 = scalar_lea.hbm %s4661_s2, 512 }
  0x37   :  { %p4330_p10 = scmp.ne.s32.totalorder %s4661_s2, %s4329_s20  ;;  %p4333_p11 = scmp.lt.u32.totalorder %s4329_s20, %s4661_s2 }
  0x39   :  { %p4335_p12 = pnand %p4333_p11, %p4330_p10 }
  0x3b   :  { %4338 = shalt.err (!%p4335_p12)
}
  0x3c   :  { %s4339_s1 = scalar_lea.vmem %s4538_s30, 512  ;;  %p4344_p0 = scmp.lt.s32.totalorder %s4538_s30, %s4538_s30 }
  0x3d   :  { %p4340_p13 = scmp.ne.s32.totalorder %s4538_s30, %s4339_s1  ;;  %p4345_p1 = scmp.lt.s32.totalorder %s4339_s1, %s4339_s1 }
  0x3f   :  { %p4346_p2 = por %p4345_p1, %p4344_p0 }
  0x41   :  { %p4347_p3 = pnand %p4346_p2, %p4340_p13 }
  0x43   :  { %4350 = shalt.err (!%p4347_p3)
}
  0x44   :  { %53 = dma.hbm_to_vmem [thread:$0]  %s4661_s2, 512, %s4538_s30, [#allocation6], %s4451_s13, %s4451_s13, %s4452_s14  }
  0x45   :  { %s4455_s26 = smov [#allocation10]   ;;  %s4351_s9 = scalar_lea.hbm %s4663_s4, 192 }
  0x46   :  { %s71_s28 = sshll.u32 %s4455_s26, 4  ;;  %p4352_p4 = scmp.ne.s32.totalorder %s4663_s4, %s4351_s9  ;;  %s72_s28 = int_to_ptr.vmem [resolvable:$true] %s71_s28 }
  0x47   :  { %p4355_p5 = scmp.lt.u32.totalorder %s4351_s9, %s4663_s4 }
  0x49   :  { %p4357_p6 = pnand %p4355_p5, %p4352_p4 }
  0x4b   :  { %4360 = shalt.err (!%p4357_p6)
}
  0x4c   :  { %s4361_s16 = scalar_lea.vmem %s72_s28, 192  ;;  %p4366_p8 = scmp.lt.s32.totalorder %s72_s28, %s72_s28 }
  0x4d   :  { %p4362_p7 = scmp.ne.s32.totalorder %s72_s28, %s4361_s16  ;;  %p4367_p9 = scmp.lt.s32.totalorder %s4361_s16, %s4361_s16 }
  0x4f   :  { %p4368_p10 = por %p4367_p9, %p4366_p8 }
  0x51   :  { %p4369_p11 = pnand %p4368_p10, %p4362_p7 }
  0x53   :  { %4372 = shalt.err (!%p4369_p11)
}
  0x54   :  { %s4456_s2 = smov 64   ;;  %s4457_s30 = smov 4  }
  0x55   :  { %77 = dma.hbm_to_vmem [thread:$0]  %s4663_s4, 192, %s72_s28, [#allocation9], %s4456_s2, %s4456_s2, %s4457_s30  }
  0x56   :  { %4439 = dma.done.wait [#allocation3], 512  }
  0x57   :  { %4440 = vsyncadd [#allocation3], 4294966784 }
  0x58   :  { %4441 = dma.done.wait [#allocation6], 1024  }
  0x59   :  { %4442 = vsyncadd [#allocation6], 4294966272 }
  0x5a   :  { %4443 = dma.done.wait [#allocation9], 49344  }
  0x5b   :  { %4444 = vsyncadd [#allocation9], 4294917952  ;;  %v3669_v0 = vld [vmem:[#allocation8 + $0x4] ss:$16 sps:$4 sm:$0xff]   ;;  %v3671_v1 = vld [vmem:[#allocation8 + $0xc] ss:$16 sps:$4 sm:$0xff]  }
  0x5c   :  { %907 = vmatprep.subr.bf16.mxu0 %v3669_v0  ;;  %v3673_v2 = vld [vmem:[#allocation8] ss:$16 sps:$4 sm:$0xff]   ;;  %v3674_v3 = vld [vmem:[#allocation8 + $0x8] ss:$16 sps:$4 sm:$0xff]   ;;  %993 = vmatprep.subr.bf16.mxu1 %v3671_v1  ;;  %v3675_v4 = vld [vmem:[#allocation8 + $0x24] ss:$16 sps:$4 sm:$0xff]  }
  0x5d   :  { %908 = vmatpush1.bf16.msra.mxu0 %v3673_v2  ;;  %994 = vmatpush1.bf16.msra.mxu1 %v3674_v3  ;;  %v3677_v5 = vld [vmem:[#allocation8 + $0x2c] ss:$16 sps:$4 sm:$0xff]   ;;  %v3679_v6 = vld [vmem:[#allocation8 + $0x20] ss:$16 sps:$4 sm:$0xff]   ;;  %v3680_v7 = vld [vmem:[#allocation8 + $0x28] ss:$16 sps:$4 sm:$0xff]  }
  0x5e   :  { %909 = vmatprep.subr.bf16.mxu0 %v3675_v4  ;;  %995 = vmatprep.subr.bf16.mxu1 %v3677_v5  ;;  %v3681_v8 = vld [vmem:[#allocation8 + $0x44] ss:$16 sps:$4 sm:$0xff]   ;;  %v3683_v9 = vld [vmem:[#allocation8 + $0x4c] ss:$16 sps:$4 sm:$0xff]   ;;  %v3685_v10 = vld [vmem:[#allocation8 + $0x40] ss:$16 sps:$4 sm:$0xff]  }
  0x5f   :  { %v3686_v11 = vld [vmem:[#allocation8 + $0x48] ss:$16 sps:$4 sm:$0xff]   ;;  %v3687_v12 = vld [vmem:[#allocation8 + $0x64] ss:$16 sps:$4 sm:$0xff]   ;;  %v3689_v13 = vld [vmem:[#allocation8 + $0x6c] ss:$16 sps:$4 sm:$0xff]  }
  0x60   :  { %v3691_v14 = vld [vmem:[#allocation8 + $0x60] ss:$16 sps:$4 sm:$0xff]   ;;  %v3692_v15 = vld [vmem:[#allocation8 + $0x68] ss:$16 sps:$4 sm:$0xff]   ;;  %v3693_v16 = vld [vmem:[#allocation8 + $0x84] ss:$16 sps:$4 sm:$0xff]  }
  0x61   :  { %910 = vmatpush1.bf16.msra.mxu0 %v3679_v6  ;;  %996 = vmatpush1.bf16.msra.mxu1 %v3680_v7  ;;  %v3695_v17 = vld [vmem:[#allocation8 + $0x8c] ss:$16 sps:$4 sm:$0xff]   ;;  %v3697_v18 = vld [vmem:[#allocation8 + $0x80] ss:$16 sps:$4 sm:$0xff]   ;;  %v3698_v19 = vld [vmem:[#allocation8 + $0x88] ss:$16 sps:$4 sm:$0xff]  }
  0x62   :  { %911 = vmatprep.subr.bf16.mxu0 %v3681_v8  ;;  %997 = vmatprep.subr.bf16.mxu1 %v3683_v9  ;;  %v3699_v20 = vld [vmem:[#allocation8 + $0xa4] ss:$16 sps:$4 sm:$0xff]   ;;  %v3701_v21 = vld [vmem:[#allocation8 + $0xac] ss:$16 sps:$4 sm:$0xff]   ;;  %v3703_v22 = vld [vmem:[#allocation8 + $0xa0] ss:$16 sps:$4 sm:$0xff]  }
  0x63   :  { %v3704_v23 = vld [vmem:[#allocation8 + $0xa8] ss:$16 sps:$4 sm:$0xff]   ;;  %v3705_v24 = vld [vmem:[#allocation8 + $0xc4] ss:$16 sps:$4 sm:$0xff]   ;;  %v3707_v25 = vld [vmem:[#allocation8 + $0xcc] ss:$16 sps:$4 sm:$0xff]  }
  0x64   :  { %v3709_v26 = vld [vmem:[#allocation8 + $0xc0] ss:$16 sps:$4 sm:$0xff]   ;;  %v3710_v27 = vld [vmem:[#allocation8 + $0xc8] ss:$16 sps:$4 sm:$0xff]   ;;  %v3711_v28 = vld [vmem:[#allocation8 + $0xe4] ss:$16 sps:$4 sm:$0xff]  }
  0x65   :  { %912 = vmatpush1.bf16.msra.mxu0 %v3685_v10  ;;  %998 = vmatpush1.bf16.msra.mxu1 %v3686_v11  ;;  %v3713_v29 = vld [vmem:[#allocation8 + $0xec] ss:$16 sps:$4 sm:$0xff]   ;;  %v3715_v30 = vld [vmem:[#allocation8 + $0xe0] ss:$16 sps:$4 sm:$0xff]   ;;  %v3716_v31 = vld [vmem:[#allocation8 + $0xe8] ss:$16 sps:$4 sm:$0xff]  }
  0x66   :  { %913 = vmatprep.subr.bf16.mxu0 %v3687_v12  ;;  %999 = vmatprep.subr.bf16.mxu1 %v3689_v13  ;;  %v3717_v32 = vld [vmem:[#allocation8 + $0x104] ss:$16 sps:$4 sm:$0xff]   ;;  %v3719_v33 = vld [vmem:[#allocation8 + $0x10c] ss:$16 sps:$4 sm:$0xff]   ;;  %v3721_v34 = vld [vmem:[#allocation8 + $0x100] ss:$16 sps:$4 sm:$0xff]  }
  0x67   :  { %v3722_v35 = vld [vmem:[#allocation8 + $0x108] ss:$16 sps:$4 sm:$0xff]   ;;  %v3723_v36 = vld [vmem:[#allocation8 + $0x124] ss:$16 sps:$4 sm:$0xff]   ;;  %v3725_v37 = vld [vmem:[#allocation8 + $0x12c] ss:$16 sps:$4 sm:$0xff]  }
  0x68   :  { %v3727_v38 = vld [vmem:[#allocation8 + $0x120] ss:$16 sps:$4 sm:$0xff]   ;;  %v3728_v39 = vld [vmem:[#allocation8 + $0x128] ss:$16 sps:$4 sm:$0xff]   ;;  %v3729_v40 = vld [vmem:[#allocation8 + $0x144] ss:$16 sps:$4 sm:$0xff]  }
  0x69   :  { %914 = vmatpush1.bf16.msra.mxu0 %v3691_v14  ;;  %1000 = vmatpush1.bf16.msra.mxu1 %v3692_v15  ;;  %v3731_v41 = vld [vmem:[#allocation8 + $0x14c] ss:$16 sps:$4 sm:$0xff]   ;;  %v3733_v42 = vld [vmem:[#allocation8 + $0x140] ss:$16 sps:$4 sm:$0xff]   ;;  %v3734_v43 = vld [vmem:[#allocation8 + $0x148] ss:$16 sps:$4 sm:$0xff]  }
  0x6a   :  { %915 = vmatprep.subr.bf16.mxu0 %v3693_v16  ;;  %1001 = vmatprep.subr.bf16.mxu1 %v3695_v17  ;;  %v3735_v44 = vld [vmem:[#allocation8 + $0x164] ss:$16 sps:$4 sm:$0xff]   ;;  %v3737_v45 = vld [vmem:[#allocation8 + $0x16c] ss:$16 sps:$4 sm:$0xff]   ;;  %v3739_v46 = vld [vmem:[#allocation8 + $0x160] ss:$16 sps:$4 sm:$0xff]  }
  0x6b   :  { %v3740_v47 = vld [vmem:[#allocation8 + $0x168] ss:$16 sps:$4 sm:$0xff]   ;;  %v3767_v48 = vld [vmem:[#allocation2 + $0x4] ss:$16 sps:$4 sm:$0xff]   ;;  %v3743_v50 = vld [vmem:[#allocation8 + $0x18c] ss:$16 sps:$4 sm:$0xff]  }
  0x6c   :  { %v3741_v49 = vld [vmem:[#allocation8 + $0x184] ss:$16 sps:$4 sm:$0xff]   ;;  %939 = vmatprep.mubr.bf16.mxu0 %v3767_v48  ;;  %1025 = vmatprep.mubr.bf16.mxu1 %v3767_v48  ;;  %v3745_v51 = vld [vmem:[#allocation8 + $0x180] ss:$16 sps:$4 sm:$0xff]   ;;  %v3746_v52 = vld [vmem:[#allocation8 + $0x188] ss:$16 sps:$4 sm:$0xff]  }
  0x6d   :  { %916 = vmatpush1.bf16.msra.mxu0 %v3697_v18  ;;  %1002 = vmatpush1.bf16.msra.mxu1 %v3698_v19  ;;  %v3747_v53 = vld [vmem:[#allocation8 + $0x1a4] ss:$16 sps:$4 sm:$0xff]   ;;  %v3749_v54 = vld [vmem:[#allocation8 + $0x1ac] ss:$16 sps:$4 sm:$0xff]   ;;  %v3751_v55 = vld [vmem:[#allocation8 + $0x1a0] ss:$16 sps:$4 sm:$0xff]  }
  0x6e   :  { %917 = vmatprep.subr.bf16.mxu0 %v3699_v20  ;;  %1003 = vmatprep.subr.bf16.mxu1 %v3701_v21  ;;  %v3752_v56 = vld [vmem:[#allocation8 + $0x1a8] ss:$16 sps:$4 sm:$0xff]   ;;  %v3753_v57 = vld [vmem:[#allocation8 + $0x1c4] ss:$16 sps:$4 sm:$0xff]   ;;  %v3755_v58 = vld [vmem:[#allocation8 + $0x1cc] ss:$16 sps:$4 sm:$0xff]  }
  0x6f   :  { %v3757_v59 = vld [vmem:[#allocation8 + $0x1c0] ss:$16 sps:$4 sm:$0xff]   ;;  %v3758_v60 = vld [vmem:[#allocation8 + $0x1c8] ss:$16 sps:$4 sm:$0xff]   ;;  %v3759_v61 = vld [vmem:[#allocation8 + $0x1e4] ss:$16 sps:$4 sm:$0xff]  }
  0x70   :  { %v3761_v62 = vld [vmem:[#allocation8 + $0x1ec] ss:$16 sps:$4 sm:$0xff]   ;;  %v3763_v63 = vld [vmem:[#allocation8 + $0x1e0] ss:$16 sps:$4 sm:$0xff]   ;;  %v3764_v0 = vld [vmem:[#allocation8 + $0x1e8] ss:$16 sps:$4 sm:$0xff]  }
  0x71   :  { %918 = vmatpush1.bf16.msra.mxu0 %v3703_v22  ;;  %1004 = vmatpush1.bf16.msra.mxu1 %v3704_v23  ;;  %v3770_v1 = vld [vmem:[#allocation8 + $0x204] ss:$16 sps:$4 sm:$0xff]   ;;  %v3773_v2 = vld [vmem:[#allocation8 + $0x20c] ss:$16 sps:$4 sm:$0xff]   ;;  %v3765_v3 = vld [vmem:[#allocation2] ss:$16 sps:$4 sm:$0xff]  }
  0x72   :  { %919 = vmatprep.subr.bf16.mxu0 %v3705_v24  ;;  %1005 = vmatprep.subr.bf16.mxu1 %v3707_v25  ;;  %v3768_v4 = vld [vmem:[#allocation8 + $0x200] ss:$16 sps:$4 sm:$0xff]   ;;  %v3771_v5 = vld [vmem:[#allocation8 + $0x208] ss:$16 sps:$4 sm:$0xff]   ;;  %v3776_v6 = vld [vmem:[#allocation8 + $0x224] ss:$16 sps:$4 sm:$0xff]  }
  0x73   :  { %v3779_v7 = vld [vmem:[#allocation8 + $0x22c] ss:$16 sps:$4 sm:$0xff]   ;;  %v3774_v8 = vld [vmem:[#allocation8 + $0x220] ss:$16 sps:$4 sm:$0xff]   ;;  %v3777_v9 = vld [vmem:[#allocation8 + $0x228] ss:$16 sps:$4 sm:$0xff]  }
  0x74   :  { %v3782_v10 = vld [vmem:[#allocation8 + $0x244] ss:$16 sps:$4 sm:$0xff]   ;;  %v3785_v11 = vld [vmem:[#allocation8 + $0x24c] ss:$16 sps:$4 sm:$0xff]   ;;  %v3780_v12 = vld [vmem:[#allocation8 + $0x240] ss:$16 sps:$4 sm:$0xff]  }
  0x75   :  { %920 = vmatpush1.bf16.msra.mxu0 %v3709_v26  ;;  %1006 = vmatpush1.bf16.msra.mxu1 %v3710_v27  ;;  %v3783_v13 = vld [vmem:[#allocation8 + $0x248] ss:$16 sps:$4 sm:$0xff]   ;;  %v3788_v14 = vld [vmem:[#allocation8 + $0x264] ss:$16 sps:$4 sm:$0xff]   ;;  %v3791_v15 = vld [vmem:[#allocation8 + $0x26c] ss:$16 sps:$4 sm:$0xff]  }
  0x76   :  { %921 = vmatprep.subr.bf16.mxu0 %v3711_v28  ;;  %1007 = vmatprep.subr.bf16.mxu1 %v3713_v29  ;;  %v3786_v16 = vld [vmem:[#allocation8 + $0x260] ss:$16 sps:$4 sm:$0xff]   ;;  %v3789_v17 = vld [vmem:[#allocation8 + $0x268] ss:$16 sps:$4 sm:$0xff]   ;;  %v3794_v18 = vld [vmem:[#allocation8 + $0x284] ss:$16 sps:$4 sm:$0xff]  }
  0x77   :  { %v3797_v19 = vld [vmem:[#allocation8 + $0x28c] ss:$16 sps:$4 sm:$0xff]   ;;  %v3792_v20 = vld [vmem:[#allocation8 + $0x280] ss:$16 sps:$4 sm:$0xff]   ;;  %v3795_v21 = vld [vmem:[#allocation8 + $0x288] ss:$16 sps:$4 sm:$0xff]  }
  0x78   :  { %v3800_v22 = vld [vmem:[#allocation8 + $0x2a4] ss:$16 sps:$4 sm:$0xff]   ;;  %v3803_v23 = vld [vmem:[#allocation8 + $0x2ac] ss:$16 sps:$4 sm:$0xff]   ;;  %v3798_v24 = vld [vmem:[#allocation8 + $0x2a0] ss:$16 sps:$4 sm:$0xff]  }
  0x79   :  { %922 = vmatpush1.bf16.msra.mxu0 %v3715_v30  ;;  %1008 = vmatpush1.bf16.msra.mxu1 %v3716_v31  ;;  %v3801_v25 = vld [vmem:[#allocation8 + $0x2a8] ss:$16 sps:$4 sm:$0xff]   ;;  %v3806_v26 = vld [vmem:[#allocation8 + $0x2c4] ss:$16 sps:$4 sm:$0xff]   ;;  %v3809_v27 = vld [vmem:[#allocation8 + $0x2cc] ss:$16 sps:$4 sm:$0xff]  }
  0x7a   :  { %923 = vmatprep.subr.bf16.mxu0 %v3717_v32  ;;  %1009 = vmatprep.subr.bf16.mxu1 %v3719_v33  ;;  %v3804_v28 = vld [vmem:[#allocation8 + $0x2c0] ss:$16 sps:$4 sm:$0xff]   ;;  %v3807_v29 = vld [vmem:[#allocation8 + $0x2c8] ss:$16 sps:$4 sm:$0xff]   ;;  %v3866_v30 = vld [vmem:[#allocation2 + $0xc] ss:$16 sps:$4 sm:$0xff]  }
  0x7b   :  { %v3812_v31 = vld [vmem:[#allocation8 + $0x2e4] ss:$16 sps:$4 sm:$0xff]   ;;  %v3815_v32 = vld [vmem:[#allocation8 + $0x2ec] ss:$16 sps:$4 sm:$0xff]   ;;  %v3810_v33 = vld [vmem:[#allocation8 + $0x2e0] ss:$16 sps:$4 sm:$0xff]  }
  0x7c   :  { %v3839_v48 = vld [vmem:[#allocation8 + $0x36c] ss:$16 sps:$4 sm:$0xff]   ;;  %s4458_s4 = smov [#allocation12]   ;;  %s4459_s18 = smov [#allocation11]  }
  0x7d   :  { %924 = vmatpush1.bf16.msra.mxu0 %v3721_v34  ;;  %1010 = vmatpush1.bf16.msra.mxu1 %v3722_v35  ;;  %v3813_v34 = vld [vmem:[#allocation8 + $0x2e8] ss:$16 sps:$4 sm:$0xff]   ;;  %v3818_v35 = vld [vmem:[#allocation8 + $0x304] ss:$16 sps:$4 sm:$0xff]   ;;  %s3156_s17 = sshll.u32 %s4458_s4, 4  ;;  %s3144_s19 = sshll.u32 %s4459_s18, 4  ;;  %s3157_s17 = int_to_ptr.vmem [resolvable:$true] %s3156_s17  ;;  %s4603_s19 = int_to_ptr.vmem [resolvable:$true] %s3144_s19 }
  0x7e   :  { %925 = vmatprep.subr.bf16.mxu0 %v3723_v36  ;;  %1011 = vmatprep.subr.bf16.mxu1 %v3725_v37  ;;  %v3821_v36 = vld [vmem:[#allocation8 + $0x30c] ss:$16 sps:$4 sm:$0xff]   ;;  %v3816_v37 = vld [vmem:[#allocation8 + $0x300] ss:$16 sps:$4 sm:$0xff]   ;;  %s4373_s20 = scalar_lea.vmem %s3157_s17, 512  ;;  %p4378_p13 = scmp.lt.s32.totalorder %s3157_s17, %s3157_s17 }
  0x7f   :  { %p4374_p12 = scmp.ne.s32.totalorder %s3157_s17, %s4373_s20  ;;  %p4379_p0 = scmp.lt.s32.totalorder %s4373_s20, %s4373_s20 }
  0x81   :  { %926 = vmatpush1.bf16.msra.mxu0 %v3727_v38  ;;  %1012 = vmatpush1.bf16.msra.mxu1 %v3728_v39  ;;  %v3819_v38 = vld [vmem:[#allocation8 + $0x308] ss:$16 sps:$4 sm:$0xff]   ;;  %v3824_v39 = vld [vmem:[#allocation8 + $0x324] ss:$16 sps:$4 sm:$0xff]   ;;  %p4380_p1 = por %p4379_p0, %p4378_p13 }
  0x82   :  { %927 = vmatprep.subr.bf16.mxu0 %v3729_v40  ;;  %1013 = vmatprep.subr.bf16.mxu1 %v3731_v41  ;;  %v3827_v40 = vld [vmem:[#allocation8 + $0x32c] ss:$16 sps:$4 sm:$0xff]   ;;  %v3822_v41 = vld [vmem:[#allocation8 + $0x320] ss:$16 sps:$4 sm:$0xff]  }
  0x83   :  { %p4381_p2 = pnand %p4380_p1, %p4374_p12 }
  0x85   :  { %928 = vmatpush1.bf16.msra.mxu0 %v3733_v42  ;;  %1014 = vmatpush1.bf16.msra.mxu1 %v3734_v43  ;;  %v3825_v42 = vld [vmem:[#allocation8 + $0x328] ss:$16 sps:$4 sm:$0xff]   ;;  %v3830_v43 = vld [vmem:[#allocation8 + $0x344] ss:$16 sps:$4 sm:$0xff]  }
  0x86   :  { %929 = vmatprep.subr.bf16.mxu0 %v3735_v44  ;;  %1015 = vmatprep.subr.bf16.mxu1 %v3737_v45  ;;  %v3833_v44 = vld [vmem:[#allocation8 + $0x34c] ss:$16 sps:$4 sm:$0xff]   ;;  %v3828_v45 = vld [vmem:[#allocation8 + $0x340] ss:$16 sps:$4 sm:$0xff]  }
  0x89   :  { %930 = vmatpush1.bf16.msra.mxu0 %v3739_v46  ;;  %1016 = vmatpush1.bf16.msra.mxu1 %v3740_v47  ;;  %v3831_v46 = vld [vmem:[#allocation8 + $0x348] ss:$16 sps:$4 sm:$0xff]   ;;  %v3836_v47 = vld [vmem:[#allocation8 + $0x364] ss:$16 sps:$4 sm:$0xff]  }
  0x8a   :  { %931 = vmatprep.subr.bf16.mxu0 %v3741_v49  ;;  %1017 = vmatprep.subr.bf16.mxu1 %v3743_v50  ;;  %v3834_v49 = vld [vmem:[#allocation8 + $0x360] ss:$16 sps:$4 sm:$0xff]   ;;  %v3837_v50 = vld [vmem:[#allocation8 + $0x368] ss:$16 sps:$4 sm:$0xff]  }
  0x8d   :  { %932 = vmatpush1.bf16.msra.mxu0 %v3745_v51  ;;  %1018 = vmatpush1.bf16.msra.mxu1 %v3746_v52  ;;  %v3842_v51 = vld [vmem:[#allocation8 + $0x384] ss:$16 sps:$4 sm:$0xff]   ;;  %v3845_v52 = vld [vmem:[#allocation8 + $0x38c] ss:$16 sps:$4 sm:$0xff]  }
  0x8e   :  { %933 = vmatprep.subr.bf16.mxu0 %v3747_v53  ;;  %1019 = vmatprep.subr.bf16.mxu1 %v3749_v54  ;;  %v3840_v53 = vld [vmem:[#allocation8 + $0x380] ss:$16 sps:$4 sm:$0xff]   ;;  %v3843_v54 = vld [vmem:[#allocation8 + $0x388] ss:$16 sps:$4 sm:$0xff]  }
  0x91   :  { %934 = vmatpush1.bf16.msra.mxu0 %v3751_v55  ;;  %1020 = vmatpush1.bf16.msra.mxu1 %v3752_v56  ;;  %v3848_v55 = vld [vmem:[#allocation8 + $0x3a4] ss:$16 sps:$4 sm:$0xff]   ;;  %v3851_v56 = vld [vmem:[#allocation8 + $0x3ac] ss:$16 sps:$4 sm:$0xff]  }
  0x92   :  { %935 = vmatprep.subr.bf16.mxu0 %v3753_v57  ;;  %1021 = vmatprep.subr.bf16.mxu1 %v3755_v58  ;;  %v3846_v57 = vld [vmem:[#allocation8 + $0x3a0] ss:$16 sps:$4 sm:$0xff]   ;;  %v3849_v58 = vld [vmem:[#allocation8 + $0x3a8] ss:$16 sps:$4 sm:$0xff]  }
  0x95   :  { %936 = vmatpush1.bf16.msra.mxu0 %v3757_v59  ;;  %1022 = vmatpush1.bf16.msra.mxu1 %v3758_v60  ;;  %v3854_v59 = vld [vmem:[#allocation8 + $0x3c4] ss:$16 sps:$4 sm:$0xff]   ;;  %v3857_v60 = vld [vmem:[#allocation8 + $0x3cc] ss:$16 sps:$4 sm:$0xff]  }
  0x96   :  { %937 = vmatprep.subr.bf16.mxu0 %v3759_v61  ;;  %1023 = vmatprep.subr.bf16.mxu1 %v3761_v62  ;;  %v3852_v61 = vld [vmem:[#allocation8 + $0x3c0] ss:$16 sps:$4 sm:$0xff]   ;;  %v3855_v62 = vld [vmem:[#allocation8 + $0x3c8] ss:$16 sps:$4 sm:$0xff]  }
  0x99   :  { %938 = vmatpush1.bf16.msra.mxu0 %v3763_v63  ;;  %1024 = vmatpush1.bf16.msra.mxu1 %v3764_v0  ;;  %v3860_v63 = vld [vmem:[#allocation8 + $0x3e4] ss:$16 sps:$4 sm:$0xff]   ;;  %v3863_v0 = vld [vmem:[#allocation8 + $0x3ec] ss:$16 sps:$4 sm:$0xff]  }
  0x9a   :  { %950 = vmatprep.subr.bf16.mxu0 %v3770_v1  ;;  %1036 = vmatprep.subr.bf16.mxu1 %v3773_v2  ;;  %v3858_v1 = vld [vmem:[#allocation8 + $0x3e0] ss:$16 sps:$4 sm:$0xff]   ;;  %v3861_v2 = vld [vmem:[#allocation8 + $0x3e8] ss:$16 sps:$4 sm:$0xff]  }
  0x9c   :  { %940 = vmatmul.mubr.bf16.vlgmr.msra.gmra.mrb[0].mxu0 %v3765_v3  ;;  %1026 = vmatmul.mubr.bf16.vlgmr.msra.gmra.mrb[0].mxu1 %v3765_v3  ;;  %v3869_v3 = vld [vmem:[#allocation8 + $0x404] ss:$16 sps:$4 sm:$0xff]  }
  0x9d   :  { %951 = vmatpush1.bf16.msra.mxu0 %v3768_v4  ;;  %1037 = vmatpush1.bf16.msra.mxu1 %v3771_v5  ;;  %v3872_v4 = vld [vmem:[#allocation8 + $0x40c] ss:$16 sps:$4 sm:$0xff]   ;;  %v3864_v5 = vld [vmem:[#allocation2 + $0x8] ss:$16 sps:$4 sm:$0xff]  }
  0x9e   :  { %952 = vmatprep.subr.bf16.mxu0 %v3776_v6  ;;  %1038 = vmatprep.subr.bf16.mxu1 %v3779_v7  ;;  %v3867_v6 = vld [vmem:[#allocation8 + $0x400] ss:$16 sps:$4 sm:$0xff]   ;;  %v3870_v7 = vld [vmem:[#allocation8 + $0x408] ss:$16 sps:$4 sm:$0xff]  }
  0x9f   :  { %982 = vmatprep.mubr.bf16.mxu0 %v3866_v30  ;;  %1068 = vmatprep.mubr.bf16.mxu1 %v3866_v30  ;;  %v3908_v30 = vld [vmem:[#allocation8 + $0x4cc] ss:$16 sps:$4 sm:$0xff]  }
  0xa1   :  { %953 = vmatpush1.bf16.msra.mxu0 %v3774_v8  ;;  %1039 = vmatpush1.bf16.msra.mxu1 %v3777_v9  ;;  %v3875_v8 = vld [vmem:[#allocation8 + $0x424] ss:$16 sps:$4 sm:$0xff]   ;;  %v3878_v9 = vld [vmem:[#allocation8 + $0x42c] ss:$16 sps:$4 sm:$0xff]  }
  0xa2   :  { %954 = vmatprep.subr.bf16.mxu0 %v3782_v10  ;;  %1040 = vmatprep.subr.bf16.mxu1 %v3785_v11  ;;  %v3873_v10 = vld [vmem:[#allocation8 + $0x420] ss:$16 sps:$4 sm:$0xff]   ;;  %v3876_v11 = vld [vmem:[#allocation8 + $0x428] ss:$16 sps:$4 sm:$0xff]  }
  0xa5   :  { %955 = vmatpush1.bf16.msra.mxu0 %v3780_v12  ;;  %1041 = vmatpush1.bf16.msra.mxu1 %v3783_v13  ;;  %v3965_v12 = vld [vmem:[#allocation5 + $0x4] ss:$16 sps:$4 sm:$0xff]  }
  0xa6   :  { %956 = vmatprep.subr.bf16.mxu0 %v3788_v14  ;;  %1042 = vmatprep.subr.bf16.mxu1 %v3791_v15  ;;  %v3881_v13 = vld [vmem:[#allocation8 + $0x444] ss:$16 sps:$4 sm:$0xff]   ;;  %v3884_v14 = vld [vmem:[#allocation8 + $0x44c] ss:$16 sps:$4 sm:$0xff]   ;;  %v3879_v15 = vld [vmem:[#allocation8 + $0x440] ss:$16 sps:$4 sm:$0xff]  }
  0xa9   :  { %957 = vmatpush1.bf16.msra.mxu0 %v3786_v16  ;;  %1043 = vmatpush1.bf16.msra.mxu1 %v3789_v17  ;;  %v3882_v16 = vld [vmem:[#allocation8 + $0x448] ss:$16 sps:$4 sm:$0xff]   ;;  %v3887_v17 = vld [vmem:[#allocation8 + $0x464] ss:$16 sps:$4 sm:$0xff]  }
  0xaa   :  { %958 = vmatprep.subr.bf16.mxu0 %v3794_v18  ;;  %1044 = vmatprep.subr.bf16.mxu1 %v3797_v19  ;;  %v3890_v18 = vld [vmem:[#allocation8 + $0x46c] ss:$16 sps:$4 sm:$0xff]   ;;  %v3885_v19 = vld [vmem:[#allocation8 + $0x460] ss:$16 sps:$4 sm:$0xff]  }
  0xad   :  { %959 = vmatpush1.bf16.msra.mxu0 %v3792_v20  ;;  %1045 = vmatpush1.bf16.msra.mxu1 %v3795_v21  ;;  %v3888_v20 = vld [vmem:[#allocation8 + $0x468] ss:$16 sps:$4 sm:$0xff]   ;;  %v3893_v21 = vld [vmem:[#allocation8 + $0x484] ss:$16 sps:$4 sm:$0xff]  }
  0xae   :  { %960 = vmatprep.subr.bf16.mxu0 %v3800_v22  ;;  %1046 = vmatprep.subr.bf16.mxu1 %v3803_v23  ;;  %v3896_v22 = vld [vmem:[#allocation8 + $0x48c] ss:$16 sps:$4 sm:$0xff]   ;;  %v3891_v23 = vld [vmem:[#allocation8 + $0x480] ss:$16 sps:$4 sm:$0xff]  }
  0xb1   :  { %961 = vmatpush1.bf16.msra.mxu0 %v3798_v24  ;;  %1047 = vmatpush1.bf16.msra.mxu1 %v3801_v25  ;;  %v3894_v24 = vld [vmem:[#allocation8 + $0x488] ss:$16 sps:$4 sm:$0xff]   ;;  %v3899_v25 = vld [vmem:[#allocation8 + $0x4a4] ss:$16 sps:$4 sm:$0xff]  }
  0xb2   :  { %962 = vmatprep.subr.bf16.mxu0 %v3806_v26  ;;  %1048 = vmatprep.subr.bf16.mxu1 %v3809_v27  ;;  %v3902_v26 = vld [vmem:[#allocation8 + $0x4ac] ss:$16 sps:$4 sm:$0xff]   ;;  %v3897_v27 = vld [vmem:[#allocation8 + $0x4a0] ss:$16 sps:$4 sm:$0xff]  }
  0xb5   :  { %963 = vmatpush1.bf16.msra.mxu0 %v3804_v28  ;;  %1049 = vmatpush1.bf16.msra.mxu1 %v3807_v29  ;;  %v3900_v28 = vld [vmem:[#allocation8 + $0x4a8] ss:$16 sps:$4 sm:$0xff]   ;;  %v3905_v29 = vld [vmem:[#allocation8 + $0x4c4] ss:$16 sps:$4 sm:$0xff]  }
  0xb6   :  { %964 = vmatprep.subr.bf16.mxu0 %v3812_v31  ;;  %1050 = vmatprep.subr.bf16.mxu1 %v3815_v32  ;;  %v3903_v31 = vld [vmem:[#allocation8 + $0x4c0] ss:$16 sps:$4 sm:$0xff]   ;;  %v3906_v32 = vld [vmem:[#allocation8 + $0x4c8] ss:$16 sps:$4 sm:$0xff]  }
  0xb9   :  { %965 = vmatpush1.bf16.msra.mxu0 %v3810_v33  ;;  %1051 = vmatpush1.bf16.msra.mxu1 %v3813_v34  ;;  %v3911_v33 = vld [vmem:[#allocation8 + $0x4e4] ss:$16 sps:$4 sm:$0xff]   ;;  %v3914_v34 = vld [vmem:[#allocation8 + $0x4ec] ss:$16 sps:$4 sm:$0xff]  }
  0xba   :  { %966 = vmatprep.subr.bf16.mxu0 %v3818_v35  ;;  %1052 = vmatprep.subr.bf16.mxu1 %v3821_v36  ;;  %v3909_v35 = vld [vmem:[#allocation8 + $0x4e0] ss:$16 sps:$4 sm:$0xff]   ;;  %v3912_v36 = vld [vmem:[#allocation8 + $0x4e8] ss:$16 sps:$4 sm:$0xff]  }
  0xbd   :  { %967 = vmatpush1.bf16.msra.mxu0 %v3816_v37  ;;  %1053 = vmatpush1.bf16.msra.mxu1 %v3819_v38  ;;  %v3917_v37 = vld [vmem:[#allocation8 + $0x504] ss:$16 sps:$4 sm:$0xff]   ;;  %v3920_v38 = vld [vmem:[#allocation8 + $0x50c] ss:$16 sps:$4 sm:$0xff]  }
  0xbe   :  { %968 = vmatprep.subr.bf16.mxu0 %v3824_v39  ;;  %1054 = vmatprep.subr.bf16.mxu1 %v3827_v40  ;;  %v3915_v39 = vld [vmem:[#allocation8 + $0x500] ss:$16 sps:$4 sm:$0xff]   ;;  %v3918_v40 = vld [vmem:[#allocation8 + $0x508] ss:$16 sps:$4 sm:$0xff]  }
  0xc1   :  { %969 = vmatpush1.bf16.msra.mxu0 %v3822_v41  ;;  %1055 = vmatpush1.bf16.msra.mxu1 %v3825_v42  ;;  %v3923_v41 = vld [vmem:[#allocation8 + $0x524] ss:$16 sps:$4 sm:$0xff]   ;;  %v3926_v42 = vld [vmem:[#allocation8 + $0x52c] ss:$16 sps:$4 sm:$0xff]  }
  0xc2   :  { %970 = vmatprep.subr.bf16.mxu0 %v3830_v43  ;;  %1056 = vmatprep.subr.bf16.mxu1 %v3833_v44  ;;  %v3921_v43 = vld [vmem:[#allocation8 + $0x520] ss:$16 sps:$4 sm:$0xff]   ;;  %v3924_v44 = vld [vmem:[#allocation8 + $0x528] ss:$16 sps:$4 sm:$0xff]  }
  0xc5   :  { %971 = vmatpush1.bf16.msra.mxu0 %v3828_v45  ;;  %1057 = vmatpush1.bf16.msra.mxu1 %v3831_v46  ;;  %v3929_v45 = vld [vmem:[#allocation8 + $0x544] ss:$16 sps:$4 sm:$0xff]   ;;  %v3932_v46 = vld [vmem:[#allocation8 + $0x54c] ss:$16 sps:$4 sm:$0xff]  }
  0xc6   :  { %972 = vmatprep.subr.bf16.mxu0 %v3836_v47  ;;  %1058 = vmatprep.subr.bf16.mxu1 %v3839_v48  ;;  %v3927_v47 = vld [vmem:[#allocation8 + $0x540] ss:$16 sps:$4 sm:$0xff]   ;;  %v3930_v48 = vld [vmem:[#allocation8 + $0x548] ss:$16 sps:$4 sm:$0xff]  }
  0xc9   :  { %973 = vmatpush1.bf16.msra.mxu0 %v3834_v49  ;;  %1059 = vmatpush1.bf16.msra.mxu1 %v3837_v50  ;;  %v3935_v49 = vld [vmem:[#allocation8 + $0x564] ss:$16 sps:$4 sm:$0xff]   ;;  %v3938_v50 = vld [vmem:[#allocation8 + $0x56c] ss:$16 sps:$4 sm:$0xff]  }
  0xca   :  { %974 = vmatprep.subr.bf16.mxu0 %v3842_v51  ;;  %1060 = vmatprep.subr.bf16.mxu1 %v3845_v52  ;;  %v3933_v51 = vld [vmem:[#allocation8 + $0x560] ss:$16 sps:$4 sm:$0xff]   ;;  %v3936_v52 = vld [vmem:[#allocation8 + $0x568] ss:$16 sps:$4 sm:$0xff]  }
  0xcd   :  { %975 = vmatpush1.bf16.msra.mxu0 %v3840_v53  ;;  %1061 = vmatpush1.bf16.msra.mxu1 %v3843_v54  ;;  %v3941_v53 = vld [vmem:[#allocation8 + $0x584] ss:$16 sps:$4 sm:$0xff]   ;;  %v3944_v54 = vld [vmem:[#allocation8 + $0x58c] ss:$16 sps:$4 sm:$0xff]  }
  0xce   :  { %976 = vmatprep.subr.bf16.mxu0 %v3848_v55  ;;  %1062 = vmatprep.subr.bf16.mxu1 %v3851_v56  ;;  %v3939_v55 = vld [vmem:[#allocation8 + $0x580] ss:$16 sps:$4 sm:$0xff]   ;;  %v3942_v56 = vld [vmem:[#allocation8 + $0x588] ss:$16 sps:$4 sm:$0xff]  }
  0xd1   :  { %977 = vmatpush1.bf16.msra.mxu0 %v3846_v57  ;;  %1063 = vmatpush1.bf16.msra.mxu1 %v3849_v58  ;;  %v3947_v57 = vld [vmem:[#allocation8 + $0x5a4] ss:$16 sps:$4 sm:$0xff]   ;;  %v3950_v58 = vld [vmem:[#allocation8 + $0x5ac] ss:$16 sps:$4 sm:$0xff]  }
  0xd2   :  { %978 = vmatprep.subr.bf16.mxu0 %v3854_v59  ;;  %1064 = vmatprep.subr.bf16.mxu1 %v3857_v60  ;;  %v3945_v59 = vld [vmem:[#allocation8 + $0x5a0] ss:$16 sps:$4 sm:$0xff]   ;;  %v3948_v60 = vld [vmem:[#allocation8 + $0x5a8] ss:$16 sps:$4 sm:$0xff]  }
  0xd5   :  { %979 = vmatpush1.bf16.msra.mxu0 %v3852_v61  ;;  %1065 = vmatpush1.bf16.msra.mxu1 %v3855_v62  ;;  %v3953_v61 = vld [vmem:[#allocation8 + $0x5c4] ss:$16 sps:$4 sm:$0xff]   ;;  %v3956_v62 = vld [vmem:[#allocation8 + $0x5cc] ss:$16 sps:$4 sm:$0xff]  }
  0xd6   :  { %980 = vmatprep.subr.bf16.mxu0 %v3860_v63  ;;  %1066 = vmatprep.subr.bf16.mxu1 %v3863_v0  ;;  %v3951_v63 = vld [vmem:[#allocation8 + $0x5c0] ss:$16 sps:$4 sm:$0xff]   ;;  %v3954_v0 = vld [vmem:[#allocation8 + $0x5c8] ss:$16 sps:$4 sm:$0xff]  }
  0xd9   :  { %981 = vmatpush1.bf16.msra.mxu0 %v3858_v1  ;;  %1067 = vmatpush1.bf16.msra.mxu1 %v3861_v2  ;;  %v3959_v1 = vld [vmem:[#allocation8 + $0x5e4] ss:$16 sps:$4 sm:$0xff]   ;;  %v3962_v2 = vld [vmem:[#allocation8 + $0x5ec] ss:$16 sps:$4 sm:$0xff]  }
  0xda   :  { %1923 = vmatprep.subr.bf16.mxu0 %v3869_v3  ;;  %2009 = vmatprep.subr.bf16.mxu1 %v3872_v4  ;;  %v3957_v3 = vld [vmem:[#allocation8 + $0x5e0] ss:$16 sps:$4 sm:$0xff]   ;;  %v3960_v4 = vld [vmem:[#allocation8 + $0x5e8] ss:$16 sps:$4 sm:$0xff]  }
  0xdc   :  { %983 = vmatmul.mubr.bf16.vlgmr.msra.gmra.mrb[0].mxu0 %v3864_v5  ;;  %1069 = vmatmul.mubr.bf16.vlgmr.msra.gmra.mrb[0].mxu1 %v3864_v5  ;;  %v3968_v5 = vld [vmem:[#allocation8 + $0x604] ss:$16 sps:$4 sm:$0xff]  }
  0xdd   :  { %1924 = vmatpush1.bf16.msra.mxu0 %v3867_v6  ;;  %2010 = vmatpush1.bf16.msra.mxu1 %v3870_v7  ;;  %v3971_v6 = vld [vmem:[#allocation8 + $0x60c] ss:$16 sps:$4 sm:$0xff]   ;;  %v3963_v7 = vld [vmem:[#allocation5] ss:$16 sps:$4 sm:$0xff]  }
  0xde   :  { %1925 = vmatprep.subr.bf16.mxu0 %v3875_v8  ;;  %2011 = vmatprep.subr.bf16.mxu1 %v3878_v9  ;;  %v3966_v8 = vld [vmem:[#allocation8 + $0x600] ss:$16 sps:$4 sm:$0xff]   ;;  %v3969_v9 = vld [vmem:[#allocation8 + $0x608] ss:$16 sps:$4 sm:$0xff]  }
  0xdf   :  { %1955 = vmatprep.mubr.bf16.mxu0 %v3965_v12  ;;  %2041 = vmatprep.mubr.bf16.mxu1 %v3965_v12  ;;  %v4064_v12 = vld [vmem:[#allocation5 + $0xc] ss:$16 sps:$4 sm:$0xff]  }
  0xe1   :  { %1926 = vmatpush1.bf16.msra.mxu0 %v3873_v10  ;;  %2012 = vmatpush1.bf16.msra.mxu1 %v3876_v11  ;;  %v3974_v10 = vld [vmem:[#allocation8 + $0x624] ss:$16 sps:$4 sm:$0xff]   ;;  %v3977_v11 = vld [vmem:[#allocation8 + $0x62c] ss:$16 sps:$4 sm:$0xff]  }
  0xe2   :  { %1927 = vmatprep.subr.bf16.mxu0 %v3881_v13  ;;  %2013 = vmatprep.subr.bf16.mxu1 %v3884_v14  ;;  %v3972_v13 = vld [vmem:[#allocation8 + $0x620] ss:$16 sps:$4 sm:$0xff]   ;;  %v3975_v14 = vld [vmem:[#allocation8 + $0x628] ss:$16 sps:$4 sm:$0xff]  }
  0xe5   :  { %1928 = vmatpush1.bf16.msra.mxu0 %v3879_v15  ;;  %2014 = vmatpush1.bf16.msra.mxu1 %v3882_v16  ;;  %v3980_v15 = vld [vmem:[#allocation8 + $0x644] ss:$16 sps:$4 sm:$0xff]   ;;  %v3983_v16 = vld [vmem:[#allocation8 + $0x64c] ss:$16 sps:$4 sm:$0xff]  }
  0xe6   :  { %1929 = vmatprep.subr.bf16.mxu0 %v3887_v17  ;;  %2015 = vmatprep.subr.bf16.mxu1 %v3890_v18  ;;  %v3978_v17 = vld [vmem:[#allocation8 + $0x640] ss:$16 sps:$4 sm:$0xff]   ;;  %v3981_v18 = vld [vmem:[#allocation8 + $0x648] ss:$16 sps:$4 sm:$0xff]  }
  0xe9   :  { %1930 = vmatpush1.bf16.msra.mxu0 %v3885_v19  ;;  %2016 = vmatpush1.bf16.msra.mxu1 %v3888_v20  ;;  %v3986_v19 = vld [vmem:[#allocation8 + $0x664] ss:$16 sps:$4 sm:$0xff]   ;;  %v3989_v20 = vld [vmem:[#allocation8 + $0x66c] ss:$16 sps:$4 sm:$0xff]  }
  0xea   :  { %1931 = vmatprep.subr.bf16.mxu0 %v3893_v21  ;;  %2017 = vmatprep.subr.bf16.mxu1 %v3896_v22  ;;  %v3984_v21 = vld [vmem:[#allocation8 + $0x660] ss:$16 sps:$4 sm:$0xff]   ;;  %v3987_v22 = vld [vmem:[#allocation8 + $0x668] ss:$16 sps:$4 sm:$0xff]  }
  0xed   :  { %1932 = vmatpush1.bf16.msra.mxu0 %v3891_v23  ;;  %2018 = vmatpush1.bf16.msra.mxu1 %v3894_v24  ;;  %v3992_v23 = vld [vmem:[#allocation8 + $0x684] ss:$16 sps:$4 sm:$0xff]   ;;  %v3995_v24 = vld [vmem:[#allocation8 + $0x68c] ss:$16 sps:$4 sm:$0xff]  }
  0xee   :  { %1933 = vmatprep.subr.bf16.mxu0 %v3899_v25  ;;  %2019 = vmatprep.subr.bf16.mxu1 %v3902_v26  ;;  %v3990_v25 = vld [vmem:[#allocation8 + $0x680] ss:$16 sps:$4 sm:$0xff]   ;;  %v3993_v26 = vld [vmem:[#allocation8 + $0x688] ss:$16 sps:$4 sm:$0xff]  }
  0xf1   :  { %1934 = vmatpush1.bf16.msra.mxu0 %v3897_v27  ;;  %2020 = vmatpush1.bf16.msra.mxu1 %v3900_v28  ;;  %v3998_v27 = vld [vmem:[#allocation8 + $0x6a4] ss:$16 sps:$4 sm:$0xff]   ;;  %v4001_v28 = vld [vmem:[#allocation8 + $0x6ac] ss:$16 sps:$4 sm:$0xff]  }
  0xf2   :  { %1935 = vmatprep.subr.bf16.mxu0 %v3905_v29  ;;  %2021 = vmatprep.subr.bf16.mxu1 %v3908_v30  ;;  %v3996_v29 = vld [vmem:[#allocation8 + $0x6a0] ss:$16 sps:$4 sm:$0xff]   ;;  %v3999_v30 = vld [vmem:[#allocation8 + $0x6a8] ss:$16 sps:$4 sm:$0xff]  }
  0xf5   :  { %1936 = vmatpush1.bf16.msra.mxu0 %v3903_v31  ;;  %2022 = vmatpush1.bf16.msra.mxu1 %v3906_v32  ;;  %v4004_v31 = vld [vmem:[#allocation8 + $0x6c4] ss:$16 sps:$4 sm:$0xff]   ;;  %v4007_v32 = vld [vmem:[#allocation8 + $0x6cc] ss:$16 sps:$4 sm:$0xff]  }
  0xf6   :  { %1937 = vmatprep.subr.bf16.mxu0 %v3911_v33  ;;  %2023 = vmatprep.subr.bf16.mxu1 %v3914_v34  ;;  %v4002_v33 = vld [vmem:[#allocation8 + $0x6c0] ss:$16 sps:$4 sm:$0xff]   ;;  %v4005_v34 = vld [vmem:[#allocation8 + $0x6c8] ss:$16 sps:$4 sm:$0xff]  }
  0xf9   :  { %1938 = vmatpush1.bf16.msra.mxu0 %v3909_v35  ;;  %2024 = vmatpush1.bf16.msra.mxu1 %v3912_v36  ;;  %v4010_v35 = vld [vmem:[#allocation8 + $0x6e4] ss:$16 sps:$4 sm:$0xff]   ;;  %v4013_v36 = vld [vmem:[#allocation8 + $0x6ec] ss:$16 sps:$4 sm:$0xff]  }
  0xfa   :  { %1939 = vmatprep.subr.bf16.mxu0 %v3917_v37  ;;  %2025 = vmatprep.subr.bf16.mxu1 %v3920_v38  ;;  %v4008_v37 = vld [vmem:[#allocation8 + $0x6e0] ss:$16 sps:$4 sm:$0xff]   ;;  %v4011_v38 = vld [vmem:[#allocation8 + $0x6e8] ss:$16 sps:$4 sm:$0xff]  }
  0xfd   :  { %1940 = vmatpush1.bf16.msra.mxu0 %v3915_v39  ;;  %2026 = vmatpush1.bf16.msra.mxu1 %v3918_v40  ;;  %v4016_v39 = vld [vmem:[#allocation8 + $0x704] ss:$16 sps:$4 sm:$0xff]   ;;  %v4019_v40 = vld [vmem:[#allocation8 + $0x70c] ss:$16 sps:$4 sm:$0xff]  }
  0xfe   :  { %1941 = vmatprep.subr.bf16.mxu0 %v3923_v41  ;;  %2027 = vmatprep.subr.bf16.mxu1 %v3926_v42  ;;  %v4014_v41 = vld [vmem:[#allocation8 + $0x700] ss:$16 sps:$4 sm:$0xff]   ;;  %v4017_v42 = vld [vmem:[#allocation8 + $0x708] ss:$16 sps:$4 sm:$0xff]  }
 0x101   :  { %1942 = vmatpush1.bf16.msra.mxu0 %v3921_v43  ;;  %2028 = vmatpush1.bf16.msra.mxu1 %v3924_v44  ;;  %v4022_v43 = vld [vmem:[#allocation8 + $0x724] ss:$16 sps:$4 sm:$0xff]   ;;  %v4025_v44 = vld [vmem:[#allocation8 + $0x72c] ss:$16 sps:$4 sm:$0xff]  }
 0x102   :  { %1943 = vmatprep.subr.bf16.mxu0 %v3929_v45  ;;  %2029 = vmatprep.subr.bf16.mxu1 %v3932_v46  ;;  %v4020_v45 = vld [vmem:[#allocation8 + $0x720] ss:$16 sps:$4 sm:$0xff]   ;;  %v4023_v46 = vld [vmem:[#allocation8 + $0x728] ss:$16 sps:$4 sm:$0xff]  }
 0x105   :  { %1944 = vmatpush1.bf16.msra.mxu0 %v3927_v47  ;;  %2030 = vmatpush1.bf16.msra.mxu1 %v3930_v48  ;;  %v4028_v47 = vld [vmem:[#allocation8 + $0x744] ss:$16 sps:$4 sm:$0xff]   ;;  %v4031_v48 = vld [vmem:[#allocation8 + $0x74c] ss:$16 sps:$4 sm:$0xff]  }
 0x106   :  { %1945 = vmatprep.subr.bf16.mxu0 %v3935_v49  ;;  %2031 = vmatprep.subr.bf16.mxu1 %v3938_v50  ;;  %v4026_v49 = vld [vmem:[#allocation8 + $0x740] ss:$16 sps:$4 sm:$0xff]   ;;  %v4029_v50 = vld [vmem:[#allocation8 + $0x748] ss:$16 sps:$4 sm:$0xff]  }
 0x109   :  { %1946 = vmatpush1.bf16.msra.mxu0 %v3933_v51  ;;  %2032 = vmatpush1.bf16.msra.mxu1 %v3936_v52  ;;  %v4034_v51 = vld [vmem:[#allocation8 + $0x764] ss:$16 sps:$4 sm:$0xff]   ;;  %v4037_v52 = vld [vmem:[#allocation8 + $0x76c] ss:$16 sps:$4 sm:$0xff]  }
 0x10a   :  { %1947 = vmatprep.subr.bf16.mxu0 %v3941_v53  ;;  %2033 = vmatprep.subr.bf16.mxu1 %v3944_v54  ;;  %v4032_v53 = vld [vmem:[#allocation8 + $0x760] ss:$16 sps:$4 sm:$0xff]   ;;  %v4035_v54 = vld [vmem:[#allocation8 + $0x768] ss:$16 sps:$4 sm:$0xff]  }
 0x10d   :  { %1948 = vmatpush1.bf16.msra.mxu0 %v3939_v55  ;;  %2034 = vmatpush1.bf16.msra.mxu1 %v3942_v56  ;;  %v4040_v55 = vld [vmem:[#allocation8 + $0x784] ss:$16 sps:$4 sm:$0xff]   ;;  %v4043_v56 = vld [vmem:[#allocation8 + $0x78c] ss:$16 sps:$4 sm:$0xff]  }
 0x10e   :  { %1949 = vmatprep.subr.bf16.mxu0 %v3947_v57  ;;  %2035 = vmatprep.subr.bf16.mxu1 %v3950_v58  ;;  %v4038_v57 = vld [vmem:[#allocation8 + $0x780] ss:$16 sps:$4 sm:$0xff]   ;;  %v4041_v58 = vld [vmem:[#allocation8 + $0x788] ss:$16 sps:$4 sm:$0xff]  }
 0x111   :  { %1950 = vmatpush1.bf16.msra.mxu0 %v3945_v59  ;;  %2036 = vmatpush1.bf16.msra.mxu1 %v3948_v60  ;;  %v4046_v59 = vld [vmem:[#allocation8 + $0x7a4] ss:$16 sps:$4 sm:$0xff]   ;;  %v4049_v60 = vld [vmem:[#allocation8 + $0x7ac] ss:$16 sps:$4 sm:$0xff]  }
 0x112   :  { %1951 = vmatprep.subr.bf16.mxu0 %v3953_v61  ;;  %2037 = vmatprep.subr.bf16.mxu1 %v3956_v62  ;;  %v4044_v61 = vld [vmem:[#allocation8 + $0x7a0] ss:$16 sps:$4 sm:$0xff]   ;;  %v4047_v62 = vld [vmem:[#allocation8 + $0x7a8] ss:$16 sps:$4 sm:$0xff]  }
 0x115   :  { %1952 = vmatpush1.bf16.msra.mxu0 %v3951_v63  ;;  %2038 = vmatpush1.bf16.msra.mxu1 %v3954_v0  ;;  %v4052_v63 = vld [vmem:[#allocation8 + $0x7c4] ss:$16 sps:$4 sm:$0xff]   ;;  %v4055_v0 = vld [vmem:[#allocation8 + $0x7cc] ss:$16 sps:$4 sm:$0xff]  }
 0x116   :  { %1953 = vmatprep.subr.bf16.mxu0 %v3959_v1  ;;  %2039 = vmatprep.subr.bf16.mxu1 %v3962_v2  ;;  %v4050_v1 = vld [vmem:[#allocation8 + $0x7c0] ss:$16 sps:$4 sm:$0xff]   ;;  %v4053_v2 = vld [vmem:[#allocation8 + $0x7c8] ss:$16 sps:$4 sm:$0xff]  }
 0x119   :  { %1954 = vmatpush1.bf16.msra.mxu0 %v3957_v3  ;;  %2040 = vmatpush1.bf16.msra.mxu1 %v3960_v4  ;;  %v4058_v3 = vld [vmem:[#allocation8 + $0x7e4] ss:$16 sps:$4 sm:$0xff]   ;;  %v4061_v4 = vld [vmem:[#allocation8 + $0x7ec] ss:$16 sps:$4 sm:$0xff]  }
 0x11a   :  { %1966 = vmatprep.subr.bf16.mxu0 %v3968_v5  ;;  %2052 = vmatprep.subr.bf16.mxu1 %v3971_v6  ;;  %v4056_v5 = vld [vmem:[#allocation8 + $0x7e0] ss:$16 sps:$4 sm:$0xff]   ;;  %v4059_v6 = vld [vmem:[#allocation8 + $0x7e8] ss:$16 sps:$4 sm:$0xff]  }
 0x11c   :  { %1956 = vmatmul.mubr.bf16.vlgmr.msra.gmra.mrb[4].mxu0 %v3963_v7  ;;  %2042 = vmatmul.mubr.bf16.vlgmr.msra.gmra.mrb[4].mxu1 %v3963_v7  ;;  %v4067_v7 = vld [vmem:[#allocation8 + $0x804] ss:$16 sps:$4 sm:$0xff]  }
 0x11d   :  { %1967 = vmatpush1.bf16.msra.mxu0 %v3966_v8  ;;  %2053 = vmatpush1.bf16.msra.mxu1 %v3969_v9  ;;  %v4070_v8 = vld [vmem:[#allocation8 + $0x80c] ss:$16 sps:$4 sm:$0xff]   ;;  %v4062_v9 = vld [vmem:[#allocation5 + $0x8] ss:$16 sps:$4 sm:$0xff]  }
 0x11e   :  { %1968 = vmatprep.subr.bf16.mxu0 %v3974_v10  ;;  %2054 = vmatprep.subr.bf16.mxu1 %v3977_v11  ;;  %v4065_v10 = vld [vmem:[#allocation8 + $0x800] ss:$16 sps:$4 sm:$0xff]   ;;  %v4068_v11 = vld [vmem:[#allocation8 + $0x808] ss:$16 sps:$4 sm:$0xff]  }
 0x11f   :  { %1998 = vmatprep.mubr.bf16.mxu0 %v4064_v12  ;;  %2084 = vmatprep.mubr.bf16.mxu1 %v4064_v12  ;;  %v4073_v12 = vld [vmem:[#allocation8 + $0x824] ss:$16 sps:$4 sm:$0xff]  }
 0x121   :  { %1969 = vmatpush1.bf16.msra.mxu0 %v3972_v13  ;;  %2055 = vmatpush1.bf16.msra.mxu1 %v3975_v14  ;;  %v4076_v13 = vld [vmem:[#allocation8 + $0x82c] ss:$16 sps:$4 sm:$0xff]   ;;  %v4163_v14 = vld [vmem:[#allocation7 + $0x4] ss:$16 sps:$4 sm:$0xff]  }
 0x122   :  { %1970 = vmatprep.subr.bf16.mxu0 %v3980_v15  ;;  %2056 = vmatprep.subr.bf16.mxu1 %v3983_v16  ;;  %v4071_v15 = vld [vmem:[#allocation8 + $0x820] ss:$16 sps:$4 sm:$0xff]   ;;  %v4074_v16 = vld [vmem:[#allocation8 + $0x828] ss:$16 sps:$4 sm:$0xff]  }
 0x125   :  { %1971 = vmatpush1.bf16.msra.mxu0 %v3978_v17  ;;  %2057 = vmatpush1.bf16.msra.mxu1 %v3981_v18  ;;  %v4079_v17 = vld [vmem:[#allocation8 + $0x844] ss:$16 sps:$4 sm:$0xff]   ;;  %v4082_v18 = vld [vmem:[#allocation8 + $0x84c] ss:$16 sps:$4 sm:$0xff]  }
 0x126   :  { %1972 = vmatprep.subr.bf16.mxu0 %v3986_v19  ;;  %2058 = vmatprep.subr.bf16.mxu1 %v3989_v20  ;;  %v4077_v19 = vld [vmem:[#allocation8 + $0x840] ss:$16 sps:$4 sm:$0xff]   ;;  %v4080_v20 = vld [vmem:[#allocation8 + $0x848] ss:$16 sps:$4 sm:$0xff]  }
 0x129   :  { %1973 = vmatpush1.bf16.msra.mxu0 %v3984_v21  ;;  %2059 = vmatpush1.bf16.msra.mxu1 %v3987_v22  ;;  %v4085_v21 = vld [vmem:[#allocation8 + $0x864] ss:$16 sps:$4 sm:$0xff]   ;;  %v4088_v22 = vld [vmem:[#allocation8 + $0x86c] ss:$16 sps:$4 sm:$0xff]  }
 0x12a   :  { %1974 = vmatprep.subr.bf16.mxu0 %v3992_v23  ;;  %2060 = vmatprep.subr.bf16.mxu1 %v3995_v24  ;;  %v4083_v23 = vld [vmem:[#allocation8 + $0x860] ss:$16 sps:$4 sm:$0xff]   ;;  %v4086_v24 = vld [vmem:[#allocation8 + $0x868] ss:$16 sps:$4 sm:$0xff]  }
 0x12d   :  { %1975 = vmatpush1.bf16.msra.mxu0 %v3990_v25  ;;  %2061 = vmatpush1.bf16.msra.mxu1 %v3993_v26  ;;  %v4091_v25 = vld [vmem:[#allocation8 + $0x884] ss:$16 sps:$4 sm:$0xff]   ;;  %v4094_v26 = vld [vmem:[#allocation8 + $0x88c] ss:$16 sps:$4 sm:$0xff]  }
 0x12e   :  { %1976 = vmatprep.subr.bf16.mxu0 %v3998_v27  ;;  %2062 = vmatprep.subr.bf16.mxu1 %v4001_v28  ;;  %v4089_v27 = vld [vmem:[#allocation8 + $0x880] ss:$16 sps:$4 sm:$0xff]   ;;  %v4092_v28 = vld [vmem:[#allocation8 + $0x888] ss:$16 sps:$4 sm:$0xff]  }
 0x131   :  { %1977 = vmatpush1.bf16.msra.mxu0 %v3996_v29  ;;  %2063 = vmatpush1.bf16.msra.mxu1 %v3999_v30  ;;  %v4097_v29 = vld [vmem:[#allocation8 + $0x8a4] ss:$16 sps:$4 sm:$0xff]   ;;  %v4100_v30 = vld [vmem:[#allocation8 + $0x8ac] ss:$16 sps:$4 sm:$0xff]  }
 0x132   :  { %1978 = vmatprep.subr.bf16.mxu0 %v4004_v31  ;;  %2064 = vmatprep.subr.bf16.mxu1 %v4007_v32  ;;  %v4095_v31 = vld [vmem:[#allocation8 + $0x8a0] ss:$16 sps:$4 sm:$0xff]   ;;  %v4098_v32 = vld [vmem:[#allocation8 + $0x8a8] ss:$16 sps:$4 sm:$0xff]  }
 0x135   :  { %1979 = vmatpush1.bf16.msra.mxu0 %v4002_v33  ;;  %2065 = vmatpush1.bf16.msra.mxu1 %v4005_v34  ;;  %v4103_v33 = vld [vmem:[#allocation8 + $0x8c4] ss:$16 sps:$4 sm:$0xff]   ;;  %v4106_v34 = vld [vmem:[#allocation8 + $0x8cc] ss:$16 sps:$4 sm:$0xff]  }
 0x136   :  { %1980 = vmatprep.subr.bf16.mxu0 %v4010_v35  ;;  %2066 = vmatprep.subr.bf16.mxu1 %v4013_v36  ;;  %v4101_v35 = vld [vmem:[#allocation8 + $0x8c0] ss:$16 sps:$4 sm:$0xff]   ;;  %v4104_v36 = vld [vmem:[#allocation8 + $0x8c8] ss:$16 sps:$4 sm:$0xff]  }
 0x139   :  { %1981 = vmatpush1.bf16.msra.mxu0 %v4008_v37  ;;  %2067 = vmatpush1.bf16.msra.mxu1 %v4011_v38  ;;  %v4109_v37 = vld [vmem:[#allocation8 + $0x8e4] ss:$16 sps:$4 sm:$0xff]   ;;  %v4112_v38 = vld [vmem:[#allocation8 + $0x8ec] ss:$16 sps:$4 sm:$0xff]  }
 0x13a   :  { %1982 = vmatprep.subr.bf16.mxu0 %v4016_v39  ;;  %2068 = vmatprep.subr.bf16.mxu1 %v4019_v40  ;;  %v4107_v39 = vld [vmem:[#allocation8 + $0x8e0] ss:$16 sps:$4 sm:$0xff]   ;;  %v4110_v40 = vld [vmem:[#allocation8 + $0x8e8] ss:$16 sps:$4 sm:$0xff]  }
 0x13d   :  { %1983 = vmatpush1.bf16.msra.mxu0 %v4014_v41  ;;  %2069 = vmatpush1.bf16.msra.mxu1 %v4017_v42  ;;  %v4115_v41 = vld [vmem:[#allocation8 + $0x904] ss:$16 sps:$4 sm:$0xff]   ;;  %v4118_v42 = vld [vmem:[#allocation8 + $0x90c] ss:$16 sps:$4 sm:$0xff]  }
 0x13e   :  { %1984 = vmatprep.subr.bf16.mxu0 %v4022_v43  ;;  %2070 = vmatprep.subr.bf16.mxu1 %v4025_v44  ;;  %v4113_v43 = vld [vmem:[#allocation8 + $0x900] ss:$16 sps:$4 sm:$0xff]   ;;  %v4116_v44 = vld [vmem:[#allocation8 + $0x908] ss:$16 sps:$4 sm:$0xff]  }
 0x141   :  { %1985 = vmatpush1.bf16.msra.mxu0 %v4020_v45  ;;  %2071 = vmatpush1.bf16.msra.mxu1 %v4023_v46  ;;  %v4121_v45 = vld [vmem:[#allocation8 + $0x924] ss:$16 sps:$4 sm:$0xff]   ;;  %v4124_v46 = vld [vmem:[#allocation8 + $0x92c] ss:$16 sps:$4 sm:$0xff]  }
 0x142   :  { %1986 = vmatprep.subr.bf16.mxu0 %v4028_v47  ;;  %2072 = vmatprep.subr.bf16.mxu1 %v4031_v48  ;;  %v4119_v47 = vld [vmem:[#allocation8 + $0x920] ss:$16 sps:$4 sm:$0xff]   ;;  %v4122_v48 = vld [vmem:[#allocation8 + $0x928] ss:$16 sps:$4 sm:$0xff]  }
 0x145   :  { %1987 = vmatpush1.bf16.msra.mxu0 %v4026_v49  ;;  %2073 = vmatpush1.bf16.msra.mxu1 %v4029_v50  ;;  %v4127_v49 = vld [vmem:[#allocation8 + $0x944] ss:$16 sps:$4 sm:$0xff]   ;;  %v4130_v50 = vld [vmem:[#allocation8 + $0x94c] ss:$16 sps:$4 sm:$0xff]  }
 0x146   :  { %1988 = vmatprep.subr.bf16.mxu0 %v4034_v51  ;;  %2074 = vmatprep.subr.bf16.mxu1 %v4037_v52  ;;  %v4125_v51 = vld [vmem:[#allocation8 + $0x940] ss:$16 sps:$4 sm:$0xff]   ;;  %v4128_v52 = vld [vmem:[#allocation8 + $0x948] ss:$16 sps:$4 sm:$0xff]  }
 0x149   :  { %1989 = vmatpush1.bf16.msra.mxu0 %v4032_v53  ;;  %2075 = vmatpush1.bf16.msra.mxu1 %v4035_v54  ;;  %v4133_v53 = vld [vmem:[#allocation8 + $0x964] ss:$16 sps:$4 sm:$0xff]   ;;  %v4136_v54 = vld [vmem:[#allocation8 + $0x96c] ss:$16 sps:$4 sm:$0xff]  }
 0x14a   :  { %1990 = vmatprep.subr.bf16.mxu0 %v4040_v55  ;;  %2076 = vmatprep.subr.bf16.mxu1 %v4043_v56  ;;  %v4131_v55 = vld [vmem:[#allocation8 + $0x960] ss:$16 sps:$4 sm:$0xff]   ;;  %v4134_v56 = vld [vmem:[#allocation8 + $0x968] ss:$16 sps:$4 sm:$0xff]  }
 0x14d   :  { %1991 = vmatpush1.bf16.msra.mxu0 %v4038_v57  ;;  %2077 = vmatpush1.bf16.msra.mxu1 %v4041_v58  ;;  %v4139_v57 = vld [vmem:[#allocation8 + $0x984] ss:$16 sps:$4 sm:$0xff]   ;;  %v4142_v58 = vld [vmem:[#allocation8 + $0x98c] ss:$16 sps:$4 sm:$0xff]  }
 0x14e   :  { %1992 = vmatprep.subr.bf16.mxu0 %v4046_v59  ;;  %2078 = vmatprep.subr.bf16.mxu1 %v4049_v60  ;;  %v4137_v59 = vld [vmem:[#allocation8 + $0x980] ss:$16 sps:$4 sm:$0xff]   ;;  %v4140_v60 = vld [vmem:[#allocation8 + $0x988] ss:$16 sps:$4 sm:$0xff]  }
 0x151   :  { %1993 = vmatpush1.bf16.msra.mxu0 %v4044_v61  ;;  %2079 = vmatpush1.bf16.msra.mxu1 %v4047_v62  ;;  %v4145_v61 = vld [vmem:[#allocation8 + $0x9a4] ss:$16 sps:$4 sm:$0xff]   ;;  %v4148_v62 = vld [vmem:[#allocation8 + $0x9ac] ss:$16 sps:$4 sm:$0xff]  }
 0x152   :  { %1994 = vmatprep.subr.bf16.mxu0 %v4052_v63  ;;  %2080 = vmatprep.subr.bf16.mxu1 %v4055_v0  ;;  %v4143_v63 = vld [vmem:[#allocation8 + $0x9a0] ss:$16 sps:$4 sm:$0xff]   ;;  %v4146_v0 = vld [vmem:[#allocation8 + $0x9a8] ss:$16 sps:$4 sm:$0xff]  }
 0x155   :  { %1995 = vmatpush1.bf16.msra.mxu0 %v4050_v1  ;;  %2081 = vmatpush1.bf16.msra.mxu1 %v4053_v2  ;;  %v4151_v1 = vld [vmem:[#allocation8 + $0x9c4] ss:$16 sps:$4 sm:$0xff]   ;;  %v4154_v2 = vld [vmem:[#allocation8 + $0x9cc] ss:$16 sps:$4 sm:$0xff]  }
 0x156   :  { %1996 = vmatprep.subr.bf16.mxu0 %v4058_v3  ;;  %2082 = vmatprep.subr.bf16.mxu1 %v4061_v4  ;;  %v4149_v3 = vld [vmem:[#allocation8 + $0x9c0] ss:$16 sps:$4 sm:$0xff]   ;;  %v4152_v4 = vld [vmem:[#allocation8 + $0x9c8] ss:$16 sps:$4 sm:$0xff]  }
 0x159   :  { %1997 = vmatpush1.bf16.msra.mxu0 %v4056_v5  ;;  %2083 = vmatpush1.bf16.msra.mxu1 %v4059_v6  ;;  %v4157_v5 = vld [vmem:[#allocation8 + $0x9e4] ss:$16 sps:$4 sm:$0xff]   ;;  %v4160_v6 = vld [vmem:[#allocation8 + $0x9ec] ss:$16 sps:$4 sm:$0xff]  }
 0x15a   :  { %2939 = vmatprep.subr.bf16.mxu0 %v4067_v7  ;;  %3025 = vmatprep.subr.bf16.mxu1 %v4070_v8  ;;  %v4155_v7 = vld [vmem:[#allocation8 + $0x9e0] ss:$16 sps:$4 sm:$0xff]   ;;  %v4158_v8 = vld [vmem:[#allocation8 + $0x9e8] ss:$16 sps:$4 sm:$0xff]  }
 0x15c   :  { %1999 = vmatmul.mubr.bf16.vlgmr.msra.gmra.mrb[4].mxu0 %v4062_v9  ;;  %2085 = vmatmul.mubr.bf16.vlgmr.msra.gmra.mrb[4].mxu1 %v4062_v9  ;;  %v4166_v9 = vld [vmem:[#allocation8 + $0xa04] ss:$16 sps:$4 sm:$0xff]  }
 0x15d   :  { %2940 = vmatpush1.bf16.msra.mxu0 %v4065_v10  ;;  %3026 = vmatpush1.bf16.msra.mxu1 %v4068_v11  ;;  %v4169_v10 = vld [vmem:[#allocation8 + $0xa0c] ss:$16 sps:$4 sm:$0xff]   ;;  %v4161_v11 = vld [vmem:[#allocation7] ss:$16 sps:$4 sm:$0xff]  }
 0x15e   :  { %2941 = vmatprep.subr.bf16.mxu0 %v4073_v12  ;;  %3027 = vmatprep.subr.bf16.mxu1 %v4076_v13  ;;  %v4164_v12 = vld [vmem:[#allocation8 + $0xa00] ss:$16 sps:$4 sm:$0xff]   ;;  %v4167_v13 = vld [vmem:[#allocation8 + $0xa08] ss:$16 sps:$4 sm:$0xff]  }
 0x15f   :  { %2971 = vmatprep.mubr.bf16.mxu0 %v4163_v14  ;;  %3057 = vmatprep.mubr.bf16.mxu1 %v4163_v14  ;;  %v4172_v14 = vld [vmem:[#allocation8 + $0xa24] ss:$16 sps:$4 sm:$0xff]  }
 0x161   :  { %2942 = vmatpush1.bf16.msra.mxu0 %v4071_v15  ;;  %3028 = vmatpush1.bf16.msra.mxu1 %v4074_v16  ;;  %v4175_v15 = vld [vmem:[#allocation8 + $0xa2c] ss:$16 sps:$4 sm:$0xff]  }
 0x162   :  { %2943 = vmatprep.subr.bf16.mxu0 %v4079_v17  ;;  %3029 = vmatprep.subr.bf16.mxu1 %v4082_v18  ;;  %v4262_v16 = vld [vmem:[#allocation7 + $0xc] ss:$16 sps:$4 sm:$0xff]   ;;  %v4170_v17 = vld [vmem:[#allocation8 + $0xa20] ss:$16 sps:$4 sm:$0xff]   ;;  %v4173_v18 = vld [vmem:[#allocation8 + $0xa28] ss:$16 sps:$4 sm:$0xff]  }
 0x165   :  { %2944 = vmatpush1.bf16.msra.mxu0 %v4077_v19  ;;  %3030 = vmatpush1.bf16.msra.mxu1 %v4080_v20  ;;  %v4178_v19 = vld [vmem:[#allocation8 + $0xa44] ss:$16 sps:$4 sm:$0xff]   ;;  %v4181_v20 = vld [vmem:[#allocation8 + $0xa4c] ss:$16 sps:$4 sm:$0xff]  }
 0x166   :  { %2945 = vmatprep.subr.bf16.mxu0 %v4085_v21  ;;  %3031 = vmatprep.subr.bf16.mxu1 %v4088_v22  ;;  %v227_v21 = vlaneseq  ;;  %v4176_v22 = vld [vmem:[#allocation8 + $0xa40] ss:$16 sps:$4 sm:$0xff]  }
 0x169   :  { %2946 = vmatpush1.bf16.msra.mxu0 %v4083_v23  ;;  %3032 = vmatpush1.bf16.msra.mxu1 %v4086_v24  ;;  %v4179_v23 = vld [vmem:[#allocation8 + $0xa48] ss:$16 sps:$4 sm:$0xff]   ;;  %v4184_v24 = vld [vmem:[#allocation8 + $0xa64] ss:$16 sps:$4 sm:$0xff]  }
 0x16a   :  { %2947 = vmatprep.subr.bf16.mxu0 %v4091_v25  ;;  %3033 = vmatprep.subr.bf16.mxu1 %v4094_v26  ;;  %v4187_v25 = vld [vmem:[#allocation8 + $0xa6c] ss:$16 sps:$4 sm:$0xff]   ;;  %v228_v26 = vshrl.u32 %v227_v21, 7  ;;  %v4227_v21 = vld [vmem:[#allocation8 + $0xb48] ss:$16 sps:$4 sm:$0xff]  }
 0x16d   :  { %2948 = vmatpush1.bf16.msra.mxu0 %v4089_v27  ;;  %3034 = vmatpush1.bf16.msra.mxu1 %v4092_v28  ;;  %v4182_v27 = vld [vmem:[#allocation8 + $0xa60] ss:$16 sps:$4 sm:$0xff]   ;;  %v4185_v28 = vld [vmem:[#allocation8 + $0xa68] ss:$16 sps:$4 sm:$0xff]  }
 0x16e   :  { %2949 = vmatprep.subr.bf16.mxu0 %v4097_v29  ;;  %3035 = vmatprep.subr.bf16.mxu1 %v4100_v30  ;;  %v4190_v29 = vld [vmem:[#allocation8 + $0xa84] ss:$16 sps:$4 sm:$0xff]   ;;  %v4193_v30 = vld [vmem:[#allocation8 + $0xa8c] ss:$16 sps:$4 sm:$0xff]  }
 0x171   :  { %2950 = vmatpush1.bf16.msra.mxu0 %v4095_v31  ;;  %3036 = vmatpush1.bf16.msra.mxu1 %v4098_v32  ;;  %v4587_v31 = vsub.s32 0, %v228_v26  ;;  %v4589_v32 = vsub.s32 2, %v228_v26 }
 0x172   :  { %2951 = vmatprep.subr.bf16.mxu0 %v4103_v33  ;;  %3037 = vmatprep.subr.bf16.mxu1 %v4106_v34  ;;  %v4591_v33 = vsub.s32 1, %v228_v26  ;;  %v4593_v34 = vsub.s32 3, %v228_v26  ;;  %v4238_v26 = vld [vmem:[#allocation8 + $0xb84] ss:$16 sps:$4 sm:$0xff]  }
 0x175   :  { %2952 = vmatpush1.bf16.msra.mxu0 %v4101_v35  ;;  %3038 = vmatpush1.bf16.msra.mxu1 %v4104_v36  ;;  %v4188_v35 = vld [vmem:[#allocation8 + $0xa80] ss:$16 sps:$4 sm:$0xff]   ;;  %v4191_v36 = vld [vmem:[#allocation8 + $0xa88] ss:$16 sps:$4 sm:$0xff]  }
 0x176   :  { %2953 = vmatprep.subr.bf16.mxu0 %v4109_v37  ;;  %3039 = vmatprep.subr.bf16.mxu1 %v4112_v38  ;;  %v225_v37 = vld [vmem:[#allocation10] sm:$0xf]  ;;  %v4196_v38 = vld [vmem:[#allocation8 + $0xaa4] ss:$16 sps:$4 sm:$0xff]  }
 0x179   :  { %2954 = vmatpush1.bf16.msra.mxu0 %v4107_v39  ;;  %3040 = vmatpush1.bf16.msra.mxu1 %v4110_v40  ;;  %v4199_v39 = vld [vmem:[#allocation8 + $0xaac] ss:$16 sps:$4 sm:$0xff]   ;;  %v230_v40 = vrot.slane %v225_v37, %v4587_v31 }
 0x17a   :  { %2955 = vmatprep.subr.bf16.mxu0 %v4115_v41  ;;  %3041 = vmatprep.subr.bf16.mxu1 %v4118_v42  ;;  %v238_v41 = vrot.slane %v225_v37, %v4589_v32  ;;  %v234_v42 = vrot.slane %v225_v37, %v4591_v33 }
 0x17d   :  { %2956 = vmatpush1.bf16.msra.mxu0 %v4113_v43  ;;  %3042 = vmatpush1.bf16.msra.mxu1 %v4116_v44  ;;  %v242_v43 = vrot.slane %v225_v37, %v4593_v34  ;;  %v4194_v44 = vld [vmem:[#allocation8 + $0xaa0] ss:$16 sps:$4 sm:$0xff]   ;;  %v4245_v37 = vld [vmem:[#allocation8 + $0xba8] ss:$16 sps:$4 sm:$0xff]  }
 0x17e   :  { %2957 = vmatprep.subr.bf16.mxu0 %v4121_v45  ;;  %3043 = vmatprep.subr.bf16.mxu1 %v4124_v46  ;;  %v4197_v45 = vld [vmem:[#allocation8 + $0xaa8] ss:$16 sps:$4 sm:$0xff]   ;;  %v4202_v46 = vld [vmem:[#allocation8 + $0xac4] ss:$16 sps:$4 sm:$0xff]  }
 0x181   :  { %2958 = vmatpush1.bf16.msra.mxu0 %v4119_v47  ;;  %3044 = vmatpush1.bf16.msra.mxu1 %v4122_v48  ;;  %v4205_v47 = vld [vmem:[#allocation8 + $0xacc] ss:$16 sps:$4 sm:$0xff]  }
 0x182   :  { %2959 = vmatprep.subr.bf16.mxu0 %v4127_v49  ;;  %3045 = vmatprep.subr.bf16.mxu1 %v4130_v50 }
 0x185   :  { %2960 = vmatpush1.bf16.msra.mxu0 %v4125_v51  ;;  %3046 = vmatpush1.bf16.msra.mxu1 %v4128_v52 }
 0x186   :  { %2961 = vmatprep.subr.bf16.mxu0 %v4133_v53  ;;  %3047 = vmatprep.subr.bf16.mxu1 %v4136_v54 }
 0x189   :  { %2962 = vmatpush1.bf16.msra.mxu0 %v4131_v55  ;;  %3048 = vmatpush1.bf16.msra.mxu1 %v4134_v56 }
 0x18a   :  { %2963 = vmatprep.subr.bf16.mxu0 %v4139_v57  ;;  %3049 = vmatprep.subr.bf16.mxu1 %v4142_v58  ;;  %v4200_v58 = vld [vmem:[#allocation8 + $0xac0] ss:$16 sps:$4 sm:$0xff]  }
 0x18d   :  { %2964 = vmatpush1.bf16.msra.mxu0 %v4137_v59  ;;  %3050 = vmatpush1.bf16.msra.mxu1 %v4140_v60  ;;  %v4203_v59 = vld [vmem:[#allocation8 + $0xac8] ss:$16 sps:$4 sm:$0xff]  }
 0x18e   :  { %2965 = vmatprep.subr.bf16.mxu0 %v4145_v61  ;;  %3051 = vmatprep.subr.bf16.mxu1 %v4148_v62 }
 0x191   :  { %2966 = vmatpush1.bf16.msra.mxu0 %v4143_v63  ;;  %3052 = vmatpush1.bf16.msra.mxu1 %v4146_v0  ;;  %v4208_v0 = vld [vmem:[#allocation8 + $0xae4] ss:$16 sps:$4 sm:$0xff]  }
 0x192   :  { %2967 = vmatprep.subr.bf16.mxu0 %v4151_v1  ;;  %3053 = vmatprep.subr.bf16.mxu1 %v4154_v2  ;;  %v4211_v1 = vld [vmem:[#allocation8 + $0xaec] ss:$16 sps:$4 sm:$0xff]  }
 0x195   :  { %2968 = vmatpush1.bf16.msra.mxu0 %v4149_v3  ;;  %3054 = vmatpush1.bf16.msra.mxu1 %v4152_v4 }
 0x196   :  { %2969 = vmatprep.subr.bf16.mxu0 %v4157_v5  ;;  %3055 = vmatprep.subr.bf16.mxu1 %v4160_v6 }
 0x199   :  { %2970 = vmatpush1.bf16.msra.mxu0 %v4155_v7  ;;  %3056 = vmatpush1.bf16.msra.mxu1 %v4158_v8  ;;  %v4206_v8 = vld [vmem:[#allocation8 + $0xae0] ss:$16 sps:$4 sm:$0xff]  }
 0x19a   :  { %2982 = vmatprep.subr.bf16.mxu0 %v4166_v9  ;;  %3068 = vmatprep.subr.bf16.mxu1 %v4169_v10  ;;  %v4209_v9 = vld [vmem:[#allocation8 + $0xae8] ss:$16 sps:$4 sm:$0xff]   ;;  %v4214_v10 = vld [vmem:[#allocation8 + $0xb04] ss:$16 sps:$4 sm:$0xff]  }
 0x19c   :  { %2972 = vmatmul.mubr.bf16.vlgmr.msra.gmra.mrb[8].mxu0 %v4161_v11  ;;  %3058 = vmatmul.mubr.bf16.vlgmr.msra.gmra.mrb[8].mxu1 %v4161_v11  ;;  %v4217_v11 = vld [vmem:[#allocation8 + $0xb0c] ss:$16 sps:$4 sm:$0xff]  }
 0x19d   :  { %2983 = vmatpush1.bf16.msra.mxu0 %v4164_v12  ;;  %3069 = vmatpush1.bf16.msra.mxu1 %v4167_v13  ;;  %v4212_v12 = vld [vmem:[#allocation8 + $0xb00] ss:$16 sps:$4 sm:$0xff]   ;;  %v4215_v13 = vld [vmem:[#allocation8 + $0xb08] ss:$16 sps:$4 sm:$0xff]  }
 0x19e   :  { %2984 = vmatprep.subr.bf16.mxu0 %v4172_v14  ;;  %3070 = vmatprep.subr.bf16.mxu1 %v4175_v15  ;;  %v4220_v14 = vld [vmem:[#allocation8 + $0xb24] ss:$16 sps:$4 sm:$0xff]   ;;  %v4223_v15 = vld [vmem:[#allocation8 + $0xb2c] ss:$16 sps:$4 sm:$0xff]  }
 0x19f   :  { %3014 = vmatprep.mubr.bf16.mxu0 %v4262_v16  ;;  %3100 = vmatprep.mubr.bf16.mxu1 %v4262_v16  ;;  %v4218_v16 = vld [vmem:[#allocation8 + $0xb20] ss:$16 sps:$4 sm:$0xff]  }
 0x1a1   :  { %2985 = vmatpush1.bf16.msra.mxu0 %v4170_v17  ;;  %3071 = vmatpush1.bf16.msra.mxu1 %v4173_v18  ;;  %v4221_v17 = vld [vmem:[#allocation8 + $0xb28] ss:$16 sps:$4 sm:$0xff]   ;;  %v4226_v18 = vld [vmem:[#allocation8 + $0xb44] ss:$16 sps:$4 sm:$0xff]  }
 0x1a2   :  { %2986 = vmatprep.subr.bf16.mxu0 %v4178_v19  ;;  %3072 = vmatprep.subr.bf16.mxu1 %v4181_v20  ;;  %v4229_v19 = vld [vmem:[#allocation8 + $0xb4c] ss:$16 sps:$4 sm:$0xff]   ;;  %v4224_v20 = vld [vmem:[#allocation8 + $0xb40] ss:$16 sps:$4 sm:$0xff]  }
 0x1a5   :  { %2987 = vmatpush1.bf16.msra.mxu0 %v4176_v22  ;;  %3073 = vmatpush1.bf16.msra.mxu1 %v4179_v23  ;;  %v4232_v22 = vld [vmem:[#allocation8 + $0xb64] ss:$16 sps:$4 sm:$0xff]   ;;  %v4235_v23 = vld [vmem:[#allocation8 + $0xb6c] ss:$16 sps:$4 sm:$0xff]  }
 0x1a6   :  { %2988 = vmatprep.subr.bf16.mxu0 %v4184_v24  ;;  %3074 = vmatprep.subr.bf16.mxu1 %v4187_v25  ;;  %v4230_v24 = vld [vmem:[#allocation8 + $0xb60] ss:$16 sps:$4 sm:$0xff]   ;;  %v4233_v25 = vld [vmem:[#allocation8 + $0xb68] ss:$16 sps:$4 sm:$0xff]  }
 0x1a9   :  { %2989 = vmatpush1.bf16.msra.mxu0 %v4182_v27  ;;  %3075 = vmatpush1.bf16.msra.mxu1 %v4185_v28  ;;  %v4241_v27 = vld [vmem:[#allocation8 + $0xb8c] ss:$16 sps:$4 sm:$0xff]   ;;  %v4236_v28 = vld [vmem:[#allocation8 + $0xb80] ss:$16 sps:$4 sm:$0xff]  }
 0x1aa   :  { %2990 = vmatprep.subr.bf16.mxu0 %v4190_v29  ;;  %3076 = vmatprep.subr.bf16.mxu1 %v4193_v30  ;;  %v4239_v29 = vld [vmem:[#allocation8 + $0xb88] ss:$16 sps:$4 sm:$0xff]   ;;  %v4244_v30 = vld [vmem:[#allocation8 + $0xba4] ss:$16 sps:$4 sm:$0xff]  }
 0x1ad   :  { %2991 = vmatpush1.bf16.msra.mxu0 %v4188_v35  ;;  %3077 = vmatpush1.bf16.msra.mxu1 %v4191_v36  ;;  %v4247_v35 = vld [vmem:[#allocation8 + $0xbac] ss:$16 sps:$4 sm:$0xff]   ;;  %v4242_v36 = vld [vmem:[#allocation8 + $0xba0] ss:$16 sps:$4 sm:$0xff]  }
 0x1ae   :  { %2992 = vmatprep.subr.bf16.mxu0 %v4196_v38  ;;  %3078 = vmatprep.subr.bf16.mxu1 %v4199_v39  ;;  %v4250_v38 = vld [vmem:[#allocation8 + $0xbc4] ss:$16 sps:$4 sm:$0xff]   ;;  %v4253_v39 = vld [vmem:[#allocation8 + $0xbcc] ss:$16 sps:$4 sm:$0xff]  }
 0x1af   :  { %v984_v48 = vpop.f32.mrb[0].mxu0  ;;  %v1070_v49 = vpop.f32.mrb[0].mxu1 }
 0x1b0   :  { %v3609_v50 = vadd.f32 %v984_v48, %v230_v40  ;;  %v3613_v51 = vadd.f32 %v1070_v49, %v238_v41  ;;  %v986_v52 = vpop.f32.mrb[1].mxu0  ;;  %v1072_v53 = vpop.f32.mrb[1].mxu1 }
 0x1b1   :  { %v3610_v54 = vadd.f32 %v986_v52, %v234_v42  ;;  %v3614_v55 = vadd.f32 %v1072_v53, %v242_v43  ;;  %v988_v56 = vpop.f32.mrb[2].mxu0  ;;  %v1074_v57 = vpop.f32.mrb[2].mxu1  ;;  %2993 = vmatpush1.bf16.msra.mxu0 %v4194_v44  ;;  %3079 = vmatpush1.bf16.msra.mxu1 %v4197_v45  ;;  %v4254_v44 = vld [vmem:[#allocation8 + $0xbe0] ss:$16 sps:$4 sm:$0xff]   ;;  %v4257_v45 = vld [vmem:[#allocation8 + $0xbe8] ss:$16 sps:$4 sm:$0xff]  }
 0x1b2   :  { %v3611_v60 = vadd.f32 %v988_v56, %v230_v40  ;;  %v3615_v61 = vadd.f32 %v1074_v57, %v238_v41  ;;  %v990_v62 = vpop.f32.mrb[3].mxu0  ;;  %v1076_v63 = vpop.f32.mrb[3].mxu1  ;;  %2994 = vmatprep.subr.bf16.mxu0 %v4202_v46  ;;  %3080 = vmatprep.subr.bf16.mxu1 %v4205_v47  ;;  %v4248_v40 = vld [vmem:[#allocation8 + $0xbc0] ss:$16 sps:$4 sm:$0xff]   ;;  %v4251_v41 = vld [vmem:[#allocation8 + $0xbc8] ss:$16 sps:$4 sm:$0xff]  }
 0x1b3   :  { %v3597_v2 = vpack.c.bf16 %v3610_v54, %v3609_v50  ;;  %v3598_v3 = vpack.c.bf16 %v3614_v55, %v3613_v51  ;;  %v3612_v4 = vadd.f32 %v990_v62, %v234_v42  ;;  %v3616_v5 = vadd.f32 %v1076_v63, %v242_v43  ;;  %v4256_v42 = vld [vmem:[#allocation8 + $0xbe4] ss:$16 sps:$4 sm:$0xff]   ;;  %v4259_v43 = vld [vmem:[#allocation8 + $0xbec] ss:$16 sps:$4 sm:$0xff]   ;;  %v4260_v46 = vld [vmem:[#allocation7 + $0x8] ss:$16 sps:$4 sm:$0xff]  }
 0x1b4   :  { %v1241_v47 = vld [vmem:[#allocation10 + $0x4] sm:$0xf] }
 0x1b5   :  { %1103 = vst [vmem:[#allocation11] sm:$0xff] %v3597_v2  ;;  %1104 = vst [vmem:[#allocation11 + $0x8] sm:$0xff] %v3598_v3  ;;  %v3599_v6 = vpack.c.bf16 %v3612_v4, %v3611_v60  ;;  %v3600_v7 = vpack.c.bf16 %v3616_v5, %v3615_v61  ;;  %2995 = vmatpush1.bf16.msra.mxu0 %v4200_v58  ;;  %3081 = vmatpush1.bf16.msra.mxu1 %v4203_v59 }
 0x1b6   :  { %2996 = vmatprep.subr.bf16.mxu0 %v4208_v0  ;;  %3082 = vmatprep.subr.bf16.mxu1 %v4211_v1  ;;  %v1246_v48 = vrot.slane %v1241_v47, %v4587_v31  ;;  %v1254_v49 = vrot.slane %v1241_v47, %v4589_v32  ;;  %v1250_v50 = vrot.slane %v1241_v47, %v4591_v33 }
 0x1b7   :  { %1105 = vst [vmem:[#allocation11 + $0x10] sm:$0xff] %v3599_v6  ;;  %1106 = vst [vmem:[#allocation11 + $0x18] sm:$0xff] %v3600_v7  ;;  %v1258_v51 = vrot.slane %v1241_v47, %v4593_v34 }
 0x1b9   :  { %2997 = vmatpush1.bf16.msra.mxu0 %v4206_v8  ;;  %3083 = vmatpush1.bf16.msra.mxu1 %v4209_v9 }
 0x1ba   :  { %2998 = vmatprep.subr.bf16.mxu0 %v4214_v10  ;;  %3084 = vmatprep.subr.bf16.mxu1 %v4217_v11 }
 0x1bd   :  { %2999 = vmatpush1.bf16.msra.mxu0 %v4212_v12  ;;  %3085 = vmatpush1.bf16.msra.mxu1 %v4215_v13 }
 0x1be   :  { %3000 = vmatprep.subr.bf16.mxu0 %v4220_v14  ;;  %3086 = vmatprep.subr.bf16.mxu1 %v4223_v15 }
 0x1c1   :  { %3001 = vmatpush1.bf16.msra.mxu0 %v4218_v16  ;;  %3087 = vmatpush1.bf16.msra.mxu1 %v4221_v17 }
 0x1c2   :  { %3002 = vmatprep.subr.bf16.mxu0 %v4226_v18  ;;  %3088 = vmatprep.subr.bf16.mxu1 %v4229_v19 }
 0x1c5   :  { %3003 = vmatpush1.bf16.msra.mxu0 %v4224_v20  ;;  %3089 = vmatpush1.bf16.msra.mxu1 %v4227_v21 }
 0x1c6   :  { %3004 = vmatprep.subr.bf16.mxu0 %v4232_v22  ;;  %3090 = vmatprep.subr.bf16.mxu1 %v4235_v23 }
 0x1c9   :  { %3005 = vmatpush1.bf16.msra.mxu0 %v4230_v24  ;;  %3091 = vmatpush1.bf16.msra.mxu1 %v4233_v25 }
 0x1ca   :  { %3006 = vmatprep.subr.bf16.mxu0 %v4238_v26  ;;  %3092 = vmatprep.subr.bf16.mxu1 %v4241_v27 }
 0x1cd   :  { %3007 = vmatpush1.bf16.msra.mxu0 %v4236_v28  ;;  %3093 = vmatpush1.bf16.msra.mxu1 %v4239_v29 }
 0x1ce   :  { %3008 = vmatprep.subr.bf16.mxu0 %v4244_v30  ;;  %3094 = vmatprep.subr.bf16.mxu1 %v4247_v35 }
 0x1d1   :  { %3009 = vmatpush1.bf16.msra.mxu0 %v4242_v36  ;;  %3095 = vmatpush1.bf16.msra.mxu1 %v4245_v37 }
 0x1d2   :  { %3010 = vmatprep.subr.bf16.mxu0 %v4250_v38  ;;  %3096 = vmatprep.subr.bf16.mxu1 %v4253_v39 }
 0x1d5   :  { %3011 = vmatpush1.bf16.msra.mxu0 %v4248_v40  ;;  %3097 = vmatpush1.bf16.msra.mxu1 %v4251_v41 }
 0x1d6   :  { %3012 = vmatprep.subr.bf16.mxu0 %v4256_v42  ;;  %3098 = vmatprep.subr.bf16.mxu1 %v4259_v43 }
 0x1d9   :  { %3013 = vmatpush1.bf16.msra.mxu0 %v4254_v44  ;;  %3099 = vmatpush1.bf16.msra.mxu1 %v4257_v45 }
 0x1dc   :  { %3015 = vmatmul.mubr.bf16.vlgmr.msra.gmra.mrb[8].mxu0 %v4260_v46  ;;  %3101 = vmatmul.mubr.bf16.vlgmr.msra.gmra.mrb[8].mxu1 %v4260_v46 }
 0x22f   :  { %v2000_v52 = vpop.f32.mrb[4].mxu0  ;;  %v2086_v53 = vpop.f32.mrb[4].mxu1 }
 0x230   :  { %v3617_v54 = vadd.f32 %v2000_v52, %v1246_v48  ;;  %v3621_v55 = vadd.f32 %v2086_v53, %v1254_v49  ;;  %v2002_v56 = vpop.f32.mrb[5].mxu0  ;;  %v2088_v57 = vpop.f32.mrb[5].mxu1 }
 0x231   :  { %v3618_v58 = vadd.f32 %v2002_v56, %v1250_v50  ;;  %v3622_v59 = vadd.f32 %v2088_v57, %v1258_v51  ;;  %v2004_v60 = vpop.f32.mrb[6].mxu0  ;;  %v2090_v61 = vpop.f32.mrb[6].mxu1 }
 0x232   :  { %v3619_v62 = vadd.f32 %v2004_v60, %v1246_v48  ;;  %v3623_v63 = vadd.f32 %v2090_v61, %v1254_v49  ;;  %v2006_v0 = vpop.f32.mrb[7].mxu0  ;;  %v2092_v1 = vpop.f32.mrb[7].mxu1 }
 0x233   :  { %v3601_v2 = vpack.c.bf16 %v3618_v58, %v3617_v54  ;;  %v3602_v3 = vpack.c.bf16 %v3622_v59, %v3621_v55  ;;  %v3620_v4 = vadd.f32 %v2006_v0, %v1250_v50  ;;  %v3624_v5 = vadd.f32 %v2092_v1, %v1258_v51 }
 0x235   :  { %2119 = vst [vmem:[#allocation12] sm:$0xff] %v3601_v2  ;;  %2120 = vst [vmem:[#allocation12 + $0x8] sm:$0xff] %v3602_v3  ;;  %v3603_v6 = vpack.c.bf16 %v3620_v4, %v3619_v62  ;;  %v3604_v7 = vpack.c.bf16 %v3624_v5, %v3623_v63 }
 0x237   :  { %2121 = vst [vmem:[#allocation12 + $0x10] sm:$0xff] %v3603_v6  ;;  %2122 = vst [vmem:[#allocation12 + $0x18] sm:$0xff] %v3604_v7 }
 0x238   :  { %4384 = shalt.err (!%p4381_p2)
}
 0x239   :  { %s4385_s23 = scalar_lea.hbm %s4665_s6, 512 }
 0x23a   :  { %p4386_p3 = scmp.ne.s32.totalorder %s4665_s6, %s4385_s23  ;;  %p4389_p4 = scmp.lt.u32.totalorder %s4385_s23, %s4665_s6 }
 0x23c   :  { %p4391_p5 = pnand %p4389_p4, %p4386_p3 }
 0x23e   :  { %4394 = shalt.err (!%p4391_p5)
}
 0x23f   :  { %3162 = dma.vmem_to_hbm [thread:$0]  %s3157_s17, 512, %s4665_s6, [#allocation13], %s4451_s13, %s4451_s13, %s4452_s14  }
 0x240   :  { %s4395_s29 = scalar_lea.vmem %s4603_s19, 512  ;;  %p4400_p7 = scmp.lt.s32.totalorder %s4603_s19, %s4603_s19 }
 0x241   :  { %p4396_p6 = scmp.ne.s32.totalorder %s4603_s19, %s4395_s29  ;;  %p4401_p8 = scmp.lt.s32.totalorder %s4395_s29, %s4395_s29 }
 0x243   :  { %p4402_p9 = por %p4401_p8, %p4400_p7 }
 0x245   :  { %p4403_p10 = pnand %p4402_p9, %p4396_p6 }
 0x247   :  { %4406 = shalt.err (!%p4403_p10)
}
 0x248   :  { %s4407_s10 = scalar_lea.hbm %s4664_s5, 512 }
 0x249   :  { %p4408_p11 = scmp.ne.s32.totalorder %s4664_s5, %s4407_s10  ;;  %p4411_p12 = scmp.lt.u32.totalorder %s4407_s10, %s4664_s5 }
 0x24b   :  { %p4413_p13 = pnand %p4411_p12, %p4408_p11 }
 0x24d   :  { %4416 = shalt.err (!%p4413_p13)
}
 0x24e   :  { %3150 = dma.vmem_to_hbm [thread:$0]  %s4603_s19, 512, %s4664_s5, [#allocation4], %s4451_s13, %s4451_s13, %s4452_s14   ;;  %v2257_v8 = vld [vmem:[#allocation10 + $0x8] sm:$0xf] }
 0x24f   :  { %v2262_v9 = vrot.slane %v2257_v8, %v4587_v31  ;;  %v2270_v10 = vrot.slane %v2257_v8, %v4589_v32  ;;  %v2266_v11 = vrot.slane %v2257_v8, %v4591_v33  ;;  %v2274_v12 = vrot.slane %v2257_v8, %v4593_v34  ;;  %s4460_s5 = smov [#allocation14]  }
 0x250   :  { %s3168_s30 = sshll.u32 %s4460_s5, 4  ;;  %s3169_s30 = int_to_ptr.vmem [resolvable:$true] %s3168_s30 }
 0x251   :  { %s4417_s3 = scalar_lea.vmem %s3169_s30, 512  ;;  %p4422_p1 = scmp.lt.s32.totalorder %s3169_s30, %s3169_s30 }
 0x252   :  { %p4418_p0 = scmp.ne.s32.totalorder %s3169_s30, %s4417_s3  ;;  %p4423_p2 = scmp.lt.s32.totalorder %s4417_s3, %s4417_s3 }
 0x254   :  { %p4424_p3 = por %p4423_p2, %p4422_p1 }
 0x256   :  { %p4425_p4 = pnand %p4424_p3, %p4418_p0 }
 0x2af   :  { %v3016_v13 = vpop.f32.mrb[8].mxu0  ;;  %v3102_v14 = vpop.f32.mrb[8].mxu1 }
 0x2b0   :  { %v3625_v15 = vadd.f32 %v3016_v13, %v2262_v9  ;;  %v3629_v16 = vadd.f32 %v3102_v14, %v2270_v10  ;;  %v3018_v17 = vpop.f32.mrb[9].mxu0  ;;  %v3104_v18 = vpop.f32.mrb[9].mxu1 }
 0x2b1   :  { %v3626_v19 = vadd.f32 %v3018_v17, %v2266_v11  ;;  %v3630_v20 = vadd.f32 %v3104_v18, %v2274_v12  ;;  %v3020_v21 = vpop.f32.mrb[10].mxu0  ;;  %v3106_v22 = vpop.f32.mrb[10].mxu1 }
 0x2b2   :  { %v3627_v23 = vadd.f32 %v3020_v21, %v2262_v9  ;;  %v3631_v24 = vadd.f32 %v3106_v22, %v2270_v10  ;;  %v3022_v25 = vpop.f32.mrb[11].mxu0  ;;  %v3108_v31 = vpop.f32.mrb[11].mxu1 }
 0x2b3   :  { %v3605_v32 = vpack.c.bf16 %v3626_v19, %v3625_v15  ;;  %v3606_v33 = vpack.c.bf16 %v3630_v20, %v3629_v16  ;;  %v3628_v26 = vadd.f32 %v3022_v25, %v2266_v11  ;;  %v3632_v34 = vadd.f32 %v3108_v31, %v2274_v12 }
 0x2b5   :  { %3135 = vst [vmem:[#allocation14] sm:$0xff] %v3605_v32  ;;  %3136 = vst [vmem:[#allocation14 + $0x8] sm:$0xff] %v3606_v33  ;;  %v3607_v27 = vpack.c.bf16 %v3628_v26, %v3627_v23  ;;  %v3608_v28 = vpack.c.bf16 %v3632_v34, %v3631_v24 }
 0x2b7   :  { %3137 = vst [vmem:[#allocation14 + $0x10] sm:$0xff] %v3607_v27  ;;  %3138 = vst [vmem:[#allocation14 + $0x18] sm:$0xff] %v3608_v28 }
 0x2b8   :  { %4428 = shalt.err (!%p4425_p4)
}
 0x2b9   :  { %s4429_s17 = scalar_lea.hbm %s4666_s7, 512 }
 0x2ba   :  { %p4430_p5 = scmp.ne.s32.totalorder %s4666_s7, %s4429_s17  ;;  %p4433_p6 = scmp.lt.u32.totalorder %s4429_s17, %s4666_s7 }
 0x2bc   :  { %p4435_p7 = pnand %p4433_p6, %p4430_p5 }
 0x2be   :  { %4438 = shalt.err (!%p4435_p7)
}
 0x2bf   :  { %3174 = dma.vmem_to_hbm [thread:$0]  %s3169_s30, 512, %s4666_s7, [#allocation13], %s4451_s13, %s4451_s13, %s4452_s14  }
 0x2c0   :  { %4445 = dma.done.wait [#allocation4], 512  }
 0x2c1   :  { %4446 = vsyncadd [#allocation4], 4294966784 }
 0x2c2   :  { %4447 = dma.done.wait [#allocation13], 1024  }
 0x2c3   :  { %4448 = vsyncadd [#allocation13], 4294966272 }
 0x2c4   :  { %3184 = vsyncpa [#allocation3], 1 }
 0x2c5   :  { %3185 = vsyncpa [#allocation6], 1 }
 0x2c6   :  { %3186 = vsyncpa [#allocation9], 1 }
 0x2c7   :  { %3187 = vsyncpa [#allocation4], 1 }
 0x2c8   :  { %3188 = vsyncpa [#allocation13], 1 }

</bundles_post_ra>
